<compile_context>
chip_gen: v7x
topology: tpu7x:2x2x1
jax: 0.10.0
libtpu: 0.0.40
codegen_flags: <defaults>
</compile_context>

<pallas_src>
import jax
import jax.numpy as jnp
from jax import lax
from jax.experimental import pallas as pl
from jax.experimental.pallas import tpu as pltpu

NEG_BIG = -9.0e15
ALPHA = 0.2          # LeakyReLU slope
BN_EPS = 1e-5


# ----------------------------------------------------------------------------
# Fused kernel: all heads of (graph attention -> SE residual block) for one
# batch element per grid step.
# ----------------------------------------------------------------------------
def _mch_fused_kernel(h_ref, comp_ref, mask_ref, wall_ref, wea_ref, a12_ref,
                      w1_ref, bn1b_ref, sew1_ref, sew2_ref,
                      w2_ref, bn2b_ref, out_ref):
    H, D, _ = a12_ref.shape
    h = h_ref[0]                                  # (N, Fn)
    N = h.shape[0]
    mask_pos = mask_ref[0] > 0                    # (N, N) bool, shared by heads

    # All heads' node projection in one lane-dense matmul.
    wh_all = jnp.dot(h, wall_ref[...],
                     preferred_element_type=jnp.float32)         # (N, H*D)
    # All heads' edge logits; comp_val read once per batch element.
    edge_all = jnp.dot(comp_ref[0], wea_ref[...],
                       preferred_element_type=jnp.float32)       # (N*N, H)

    # Row masks for the zero-padded conv edges (built once, reused by all heads).
    row = lax.broadcasted_iota(jnp.int32, (N, D), 0)
    is_first = row == 0
    is_last = row == N - 1

    def conv3(v, w):
        # Conv1d(k=3, pad=1): out[l] = v[l-1]@w[0] + v[l]@w[1] + v[l+1]@w[2]
        # Cyclic shifts (XLU slot) + edge masks replace concatenate copies.
        vm = jnp.where(is_first, 0.0, pltpu.roll(v, shift=1, axis=0))
        vp = jnp.where(is_last, 0.0, pltpu.roll(v, shift=N - 1, axis=0))
        return (jnp.dot(vm, w[0], preferred_element_type=jnp.float32)
                + jnp.dot(v, w[1], preferred_element_type=jnp.float32)
                + jnp.dot(vp, w[2], preferred_element_type=jnp.float32))

    head_outs = []
    for hh in range(H):                           # static unroll over heads
        wh = wh_all[:, hh * D:(hh + 1) * D]                              # (N, D)
        # Wh@a1 and Wh@a2 in one (D,2) matmul.
        l12 = jnp.dot(wh, a12_ref[hh], preferred_element_type=jnp.float32)  # (N, 2)
        e = l12[:, 0:1] + l12[:, 1:2].T + edge_all[:, hh:hh + 1].reshape(N, N)
        e = jnp.where(e > 0, e, ALPHA * e)                               # LeakyReLU
        att = jnp.where(mask_pos, e, NEG_BIG)

        # softmax over the last dim
        att = att - jnp.max(att, axis=-1, keepdims=True)
        p = jnp.exp(att)
        att = p * pl.reciprocal(jnp.sum(p, axis=-1, keepdims=True), approx=False)

        x = jnp.dot(att, wh, preferred_element_type=jnp.float32)        # (N, D)

        # --- LightweightResidualBlock (eval mode, BN scale folded in weights) ---
        out = conv3(x, w1_ref[hh]) + bn1b_ref[hh]
        out = jnp.maximum(out, 0.0)

        # SE block: global mean over length, two small FCs, sigmoid channel gate
        y = jnp.mean(out, axis=0, keepdims=True)                        # (1, D)
        y = jnp.maximum(
            jnp.dot(y, sew1_ref[hh], preferred_element_type=jnp.float32), 0.0)
        y = jax.nn.sigmoid(
            jnp.dot(y, sew2_ref[hh], preferred_element_type=jnp.float32))
        out = out * y

        out = conv3(out, w2_ref[hh]) + bn2b_ref[hh]
        out = jnp.maximum(out + x, 0.0)           # identity shortcut + ReLU
        head_outs.append(out)

    # Single lane-dense store of the concatenated heads.
    out_ref[0] = jnp.concatenate(head_outs, axis=-1)                    # (N, H*D)


# ----------------------------------------------------------------------------
# Wrapper
# ----------------------------------------------------------------------------
def _rep_spec(shape):
    nd = len(shape)
    return pl.BlockSpec(shape, lambda b, nd=nd: (0,) * nd)


def _stack_head_params(head_params):
    W_all = jnp.concatenate([p["W"] for p in head_params], axis=1)       # (Fn, H*D)
    # Hoisted, grid-invariant: W_edge @ a3 per head -> (Fe, H)
    wea = jnp.concatenate([p["We"] @ p["a3"] for p in head_params], axis=1)
    a12 = jnp.stack([jnp.concatenate([p["a1"], p["a2"]], axis=1)
                     for p in head_params], axis=0)                      # (H, D, 2)
    # Fold the eval-mode BatchNorm scale into the conv taps (per out-channel).
    w1 = jnp.stack([p["w1"] * p["bn1s"] for p in head_params], axis=0)   # (H, 3, D, D)
    w2 = jnp.stack([p["w2"] * p["bn2s"] for p in head_params], axis=0)
    bn1b = jnp.stack([p["bn1b"] for p in head_params], axis=0)           # (H, 1, D)
    bn2b = jnp.stack([p["bn2b"] for p in head_params], axis=0)
    sew1 = jnp.stack([p["sew1"] for p in head_params], axis=0)           # (H, D, Dr)
    sew2 = jnp.stack([p["sew2"] for p in head_params], axis=0)           # (H, Dr, D)
    return W_all, wea, a12, w1, bn1b, sew1, sew2, w2, bn2b


def mch_multihead_attn_forward(h, mch_mask, comp_val, head_params,
                               activation=None, concat=True):
    """Forward pass of MCH_MultiHeadAttnBlock (eval mode: dropout = identity)."""
    # TODO(synk): training-mode dropout (on h and on the attention matrix) is
    # intentionally omitted (eval semantics).
    B, N, Fn = h.shape
    Fe = comp_val.shape[-1]
    H = len(head_params)
    D = head_params[0]["W"].shape[1]
    Dr = head_params[0]["sew1"].shape[1]

    # Reshape the big tensor at HBM layout time (free), not inside the kernel.
    comp2d = comp_val.reshape(B, N * N, Fe)
    (wall, wea, a12, w1, bn1b,
     sew1, sew2, w2, bn2b) = _stack_head_params(head_params)

    out = pl.pallas_call(
        _mch_fused_kernel,
        out_shape=jax.ShapeDtypeStruct((B, N, H * D), jnp.float32),
        grid=(B,),
        in_specs=[
            pl.BlockSpec((1, N, Fn), lambda b: (b, 0, 0)),
            pl.BlockSpec((1, N * N, Fe), lambda b: (b, 0, 0)),
            pl.BlockSpec((1, N, N), lambda b: (b, 0, 0)),
            _rep_spec((Fn, H * D)),
            _rep_spec((Fe, H)),
            _rep_spec((H, D, 2)),
            _rep_spec((H, 3, D, D)),
            _rep_spec((H, 1, D)),
            _rep_spec((H, D, Dr)),
            _rep_spec((H, Dr, D)),
            _rep_spec((H, 3, D, D)),
            _rep_spec((H, 1, D)),
        ],
        out_specs=pl.BlockSpec((1, N, H * D), lambda b: (b, 0, 0)),
        compiler_params=pltpu.CompilerParams(
            # Batch elements are independent -> shard across v7x's 2 TCs.
            dimension_semantics=("parallel",)),
    )(h, comp2d, mch_mask, wall, wea, a12, w1, bn1b,
      sew1, sew2, w2, bn2b)

    if concat:
        res = out                                            # (B, N, H*D)
    else:
        res = out.reshape(B, N, H, D).mean(axis=2)           # mean over heads
    return res if activation is None else activation(res)


# ----------------------------------------------------------------------------
# Parameter construction (deterministic, matches the shapes in __init__)
# ----------------------------------------------------------------------------
def xavier_uniform(key, shape, gain=1.414):
    fan_in, fan_out = shape[0], shape[1]
    bound = gain * (6.0 / (fan_in + fan_out)) ** 0.5
    return jax.random.uniform(key, shape, jnp.float32, -bound, bound)


def make_head_params(key, Fn, Fe, D, reduction=16):
    ks = jax.random.split(key, 16)
    Dr = max(D // reduction, 1)
    W = xavier_uniform(ks[0], (Fn, D))
    We = xavier_uniform(ks[1], (Fe, D))
    a = xavier_uniform(ks[2], (3 * D, 1))
    a1, a2, a3 = a[:D], a[D:2 * D], a[2 * D:]

    def conv_w(k):  # (tap, in, out) -- transposed PyTorch (out, in, k)
        bound = 1.0 / (3.0 * D) ** 0.5
        return jax.random.uniform(k, (3, D, D), jnp.float32, -bound, bound)

    def bn_affine(kg, kb, km, kv):
        gamma = jax.random.uniform(kg, (1, D), jnp.float32, 0.5, 1.5)
        beta = jax.random.uniform(kb, (1, D), jnp.float32, -0.1, 0.1)
        mean = jax.random.uniform(km, (1, D), jnp.float32, -0.1, 0.1)
        var = jax.random.uniform(kv, (1, D), jnp.float32, 0.5, 1.5)
        scale = gamma / jnp.sqrt(var + BN_EPS)
        bias = beta - mean * scale
        return scale, bias

    bn1s, bn1b = bn_affine(ks[3], ks[4], ks[5], ks[6])
    bn2s, bn2b = bn_affine(ks[7], ks[8], ks[9], ks[10])
    # SE fc weights passed pre-transposed: fc1.weight.T (D, Dr), fc2.weight.T (Dr, D)
    sew1 = xavier_uniform(ks[11], (D, Dr), gain=1.0)
    sew2 = xavier_uniform(ks[12], (Dr, D), gain=1.0)
    return dict(W=W, We=We, a1=a1, a2=a2, a3=a3,
                w1=conv_w(ks[13]), w2=conv_w(ks[14]),
                bn1s=bn1s, bn1b=bn1b, bn2s=bn2s, bn2b=bn2b,
                sew1=sew1, sew2=sew2)


# ----------------------------------------------------------------------------
# Pure-JAX reference (for correctness check)
# ----------------------------------------------------------------------------
def ref_forward(h, mask, comp, head_params):
    outs = []
    for p in head_params:
        Wh = h @ p["W"]
        Wh1 = Wh @ p["a1"]
        Wh2 = Wh @ p["a2"]
        edge = ((comp @ p["We"]) @ p["a3"])[..., 0]
        e = Wh1 + jnp.swapaxes(Wh2, -1, -2) + edge
        e = jnp.where(e > 0, e, ALPHA * e)
        att = jnp.where(mask > 0, e, NEG_BIG)
        att = jax.nn.softmax(att, axis=-1)
        x = jnp.einsum("bij,bjd->bid", att, Wh)

        def conv3(v, w):
            z = jnp.zeros_like(v[:, :1, :])
            vm = jnp.concatenate([z, v[:, :-1, :]], axis=1)
            vp = jnp.concatenate([v[:, 1:, :], z], axis=1)
            return vm @ w[0] + v @ w[1] + vp @ w[2]

        out = conv3(x, p["w1"]) * p["bn1s"] + p["bn1b"]
        out = jnp.maximum(out, 0.0)
        y = jnp.mean(out, axis=1, keepdims=True)
        y = jnp.maximum(y @ p["sew1"], 0.0)
        y = jax.nn.sigmoid(y @ p["sew2"])
        out = out * y
        out = conv3(out, p["w2"]) * p["bn2s"] + p["bn2b"]
        out = jnp.maximum(out + x, 0.0)
        outs.append(out)
    return jnp.concatenate(outs, axis=-1)


# ----------------------------------------------------------------------------
if __name__ == "__main__":
    B, N = 2, 8                 # batch, num graph nodes
    Fn, Fe, D = 16, 8, 32       # node_input_dim, edge_input_dim, output_dim
    num_heads = 2

    key = jax.random.PRNGKey(0)
    k_h, k_c, k_m, k_p = jax.random.split(key, 4)

    h = jax.random.normal(k_h, (B, N, Fn), jnp.float32)
    comp_val = jax.random.normal(k_c, (B, N, N, Fe), jnp.float32)
    mch_mask = (jax.random.uniform(k_m, (B, N, N)) > 0.3).astype(jnp.float32)
    # make sure every row has at least one unmasked entry (self-edge)
    eye = jnp.eye(N, dtype=jnp.float32)[None]
    mch_mask = jnp.maximum(mch_mask, jnp.broadcast_to(eye, mch_mask.shape))

    head_keys = jax.random.split(k_p, num_heads)
    head_params = [make_head_params(k, Fn, Fe, D) for k in head_keys]

    out = mch_multihead_attn_forward(h, mch_mask, comp_val, head_params,
                                     activation=None, concat=True)
    out = jax.block_until_ready(out)

    # Reference in full f32 matmul precision so the check is meaningful on TPU.
    with jax.default_matmul_precision("float32"):
        ref = ref_forward(h, mch_mask, comp_val, head_params)
    ref = jax.block_until_ready(ref)

    assert out.shape == (B, N, D * num_heads), out.shape
    assert jnp.allclose(out, ref, rtol=5e-3, atol=5e-3), \
        float(jnp.max(jnp.abs(out - ref)))

    print("KERNEL_OK")
</pallas_src>

<mosaic_0001>
module attributes {stable_mosaic.version = 11 : i64} {
  func.func @_mch_fused_kernel(%arg0: i32, %arg1: memref<1x8x16xf32, #tpu.memory_space<vmem>>, %arg2: memref<1x64x8xf32, #tpu.memory_space<vmem>>, %arg3: memref<1x8x8xf32, #tpu.memory_space<vmem>>, %arg4: memref<16x64xf32, #tpu.memory_space<vmem>>, %arg5: memref<8x2xf32, #tpu.memory_space<vmem>>, %arg6: memref<2x32x2xf32, #tpu.memory_space<vmem>>, %arg7: memref<2x3x32x32xf32, #tpu.memory_space<vmem>>, %arg8: memref<2x1x32xf32, #tpu.memory_space<vmem>>, %arg9: memref<2x32x2xf32, #tpu.memory_space<vmem>>, %arg10: memref<2x2x32xf32, #tpu.memory_space<vmem>>, %arg11: memref<2x3x32x32xf32, #tpu.memory_space<vmem>>, %arg12: memref<2x1x32xf32, #tpu.memory_space<vmem>>, %arg13: memref<1x8x64xf32, #tpu.memory_space<vmem>>) attributes {dimension_semantics = [#tpu.dimension_semantics<parallel>], iteration_bounds = array<i64: 2>, scalar_prefetch = 0 : i64, scratch_operands = 0 : i64, tpu.core_type = #tpu.core_type<tc>, window_params = [{transform_indices = @transform_0, window_bounds = array<i64: 1, 8, 16>}, {transform_indices = @transform_1, window_bounds = array<i64: 1, 64, 8>}, {transform_indices = @transform_2, window_bounds = array<i64: 1, 8, 8>}, {pipeline_mode = #tpu.pipeline_mode<synchronous>, transform_indices = @transform_3, window_bounds = array<i64: 16, 64>}, {pipeline_mode = #tpu.pipeline_mode<synchronous>, transform_indices = @transform_4, window_bounds = array<i64: 8, 2>}, {pipeline_mode = #tpu.pipeline_mode<synchronous>, transform_indices = @transform_5, window_bounds = array<i64: 2, 32, 2>}, {pipeline_mode = #tpu.pipeline_mode<synchronous>, transform_indices = @transform_6, window_bounds = array<i64: 2, 3, 32, 32>}, {pipeline_mode = #tpu.pipeline_mode<synchronous>, transform_indices = @transform_7, window_bounds = array<i64: 2, 1, 32>}, {pipeline_mode = #tpu.pipeline_mode<synchronous>, transform_indices = @transform_8, window_bounds = array<i64: 2, 32, 2>}, {pipeline_mode = #tpu.pipeline_mode<synchronous>, transform_indices = @transform_9, window_bounds = array<i64: 2, 2, 32>}, {pipeline_mode = #tpu.pipeline_mode<synchronous>, transform_indices = @transform_10, window_bounds = array<i64: 2, 3, 32, 32>}, {pipeline_mode = #tpu.pipeline_mode<synchronous>, transform_indices = @transform_11, window_bounds = array<i64: 2, 1, 32>}, {transform_indices = @transform_12, window_bounds = array<i64: 1, 8, 64>}]} {
    %c0 = arith.constant 0 : index
    %c0_0 = arith.constant 0 : index
    %c0_1 = arith.constant 0 : index
    %0 = vector.load %arg1[%c0, %c0_0, %c0_1] : memref<1x8x16xf32, #tpu.memory_space<vmem>>, vector<1x8x16xf32>
    %1 = vector.shape_cast %0 : vector<1x8x16xf32> to vector<8x16xf32>
    %c0_2 = arith.constant 0 : index
    %c0_3 = arith.constant 0 : index
    %c0_4 = arith.constant 0 : index
    %2 = vector.load %arg3[%c0_2, %c0_3, %c0_4] : memref<1x8x8xf32, #tpu.memory_space<vmem>>, vector<1x8x8xf32>
    %3 = vector.shape_cast %2 : vector<1x8x8xf32> to vector<8x8xf32>
    %cst = arith.constant 0.000000e+00 : f32
    %4 = vector.broadcast %cst : f32 to vector<8x8xf32>
    %5 = arith.cmpf ogt, %3, %4 : vector<8x8xf32>
    %c0_5 = arith.constant 0 : index
    %c0_6 = arith.constant 0 : index
    %6 = vector.load %arg4[%c0_5, %c0_6] : memref<16x64xf32, #tpu.memory_space<vmem>>, vector<16x64xf32>
    %cst_7 = arith.constant dense<0.000000e+00> : vector<8x64xf32>
    %7 = tpu.matmul %1, %6, %cst_7 {dimension_numbers = #tpu.dot_dimension_numbers<[1], [0], [0], [1], [0, 0, 1, 1], [], []>} : vector<8x16xf32>, vector<16x64xf32>, vector<8x64xf32> -> vector<8x64xf32>
    %c0_8 = arith.constant 0 : index
    %c0_9 = arith.constant 0 : index
    %c0_10 = arith.constant 0 : index
    %8 = vector.load %arg2[%c0_8, %c0_9, %c0_10] : memref<1x64x8xf32, #tpu.memory_space<vmem>>, vector<1x64x8xf32>
    %9 = vector.shape_cast %8 : vector<1x64x8xf32> to vector<64x8xf32>
    %c0_11 = arith.constant 0 : index
    %c0_12 = arith.constant 0 : index
    %10 = vector.load %arg5[%c0_11, %c0_12] : memref<8x2xf32, #tpu.memory_space<vmem>>, vector<8x2xf32>
    %cst_13 = arith.constant dense<0.000000e+00> : vector<64x2xf32>
    %11 = tpu.matmul %9, %10, %cst_13 {dimension_numbers = #tpu.dot_dimension_numbers<[1], [0], [0], [1], [0, 0, 1, 1], [], []>} : vector<64x8xf32>, vector<8x2xf32>, vector<64x2xf32> -> vector<64x2xf32>
    %12 = tpu.iota {dimensions = array<i32: 0>} : vector<8x32xi32>
    %c0_i32 = arith.constant 0 : i32
    %13 = vector.broadcast %c0_i32 : i32 to vector<8x32xi32>
    %14 = arith.cmpi eq, %12, %13 : vector<8x32xi32>
    %c7_i32 = arith.constant 7 : i32
    %15 = vector.broadcast %c7_i32 : i32 to vector<8x32xi32>
    %16 = arith.cmpi eq, %12, %15 : vector<8x32xi32>
    %17 = vector.extract_strided_slice %7 {offsets = [0, 0], sizes = [8, 32], strides = [1, 1]} : vector<8x64xf32> to vector<8x32xf32>
    %c0_14 = arith.constant 0 : index
    %c0_15 = arith.constant 0 : index
    %c0_16 = arith.constant 0 : index
    %18 = vector.load %arg6[%c0_14, %c0_15, %c0_16] : memref<2x32x2xf32, #tpu.memory_space<vmem>>, vector<1x32x2xf32>
    %19 = vector.shape_cast %18 : vector<1x32x2xf32> to vector<32x2xf32>
    %cst_17 = arith.constant dense<0.000000e+00> : vector<8x2xf32>
    %20 = tpu.matmul %17, %19, %cst_17 {dimension_numbers = #tpu.dot_dimension_numbers<[1], [0], [0], [1], [0, 0, 1, 1], [], []>} : vector<8x32xf32>, vector<32x2xf32>, vector<8x2xf32> -> vector<8x2xf32>
    %21 = vector.extract_strided_slice %20 {offsets = [0, 0], sizes = [8, 1], strides = [1, 1]} : vector<8x2xf32> to vector<8x1xf32>
    %22 = vector.extract_strided_slice %20 {offsets = [0, 1], sizes = [8, 1], strides = [1, 1]} : vector<8x2xf32> to vector<8x1xf32>
    %23 = tpu.transpose %22, [1, 0] : vector<8x1xf32> -> vector<1x8xf32>
    %24 = vector.broadcast %21 : vector<8x1xf32> to vector<8x8xf32>
    %25 = vector.broadcast %23 : vector<1x8xf32> to vector<8x8xf32>
    %26 = arith.addf %24, %25 : vector<8x8xf32>
    %27 = vector.extract_strided_slice %11 {offsets = [0, 0], sizes = [64, 1], strides = [1, 1]} : vector<64x2xf32> to vector<64x1xf32>
    %28 = vector.shape_cast %27 : vector<64x1xf32> to vector<8x8xf32>
    %29 = arith.addf %26, %28 : vector<8x8xf32>
    %cst_18 = arith.constant 0.000000e+00 : f32
    %30 = vector.broadcast %cst_18 : f32 to vector<8x8xf32>
    %31 = arith.cmpf ogt, %29, %30 : vector<8x8xf32>
    %cst_19 = arith.constant 2.000000e-01 : f32
    %32 = vector.broadcast %cst_19 : f32 to vector<8x8xf32>
    %33 = arith.mulf %32, %29 : vector<8x8xf32>
    %34 = arith.select %31, %29, %33 : vector<8x8xi1>, vector<8x8xf32>
    %cst_20 = arith.constant -9.000000e+15 : f32
    %35 = vector.broadcast %cst_20 : f32 to vector<8x8xf32>
    %36 = arith.select %5, %34, %35 : vector<8x8xi1>, vector<8x8xf32>
    %cst_21 = arith.constant dense<0xFF800000> : vector<8xf32>
    %37 = vector.multi_reduction <maximumf>, %36, %cst_21 [1] : vector<8x8xf32> to vector<8xf32>
    %38 = vector.shape_cast %37 : vector<8xf32> to vector<8x1xf32>
    %39 = vector.broadcast %38 : vector<8x1xf32> to vector<8x8xf32>
    %40 = arith.subf %36, %39 : vector<8x8xf32>
    %41 = math.exp %40 : vector<8x8xf32>
    %cst_22 = arith.constant dense<0.000000e+00> : vector<8xf32>
    %42 = vector.multi_reduction <add>, %41, %cst_22 [1] : vector<8x8xf32> to vector<8xf32>
    %43 = vector.shape_cast %42 : vector<8xf32> to vector<8x1xf32>
    %44 = tpu.reciprocal %43 : vector<8x1xf32> -> vector<8x1xf32>
    %45 = vector.broadcast %44 : vector<8x1xf32> to vector<8x8xf32>
    %46 = arith.mulf %41, %45 : vector<8x8xf32>
    %cst_23 = arith.constant dense<0.000000e+00> : vector<8x32xf32>
    %47 = tpu.matmul %46, %17, %cst_23 {dimension_numbers = #tpu.dot_dimension_numbers<[1], [0], [0], [1], [0, 0, 1, 1], [], []>} : vector<8x8xf32>, vector<8x32xf32>, vector<8x32xf32> -> vector<8x32xf32>
    %c0_24 = arith.constant 0 : index
    %c0_25 = arith.constant 0 : index
    %c0_26 = arith.constant 0 : index
    %c0_27 = arith.constant 0 : index
    %48 = vector.load %arg7[%c0_24, %c0_25, %c0_26, %c0_27] : memref<2x3x32x32xf32, #tpu.memory_space<vmem>>, vector<1x3x32x32xf32>
    %49 = vector.shape_cast %48 : vector<1x3x32x32xf32> to vector<3x32x32xf32>
    %c1_i32 = arith.constant 1 : i32
    %50 = tpu.dynamic_rotate %47 by %c1_i32 dim 0 : vector<8x32xf32>, i32 -> vector<8x32xf32>
    %cst_28 = arith.constant 0.000000e+00 : f32
    %51 = vector.broadcast %cst_28 : f32 to vector<8x32xf32>
    %52 = arith.select %14, %51, %50 : vector<8x32xi1>, vector<8x32xf32>
    %c7_i32_29 = arith.constant 7 : i32
    %53 = tpu.dynamic_rotate %47 by %c7_i32_29 dim 0 : vector<8x32xf32>, i32 -> vector<8x32xf32>
    %cst_30 = arith.constant 0.000000e+00 : f32
    %54 = vector.broadcast %cst_30 : f32 to vector<8x32xf32>
    %55 = arith.select %16, %54, %53 : vector<8x32xi1>, vector<8x32xf32>
    %56 = vector.extract_strided_slice %49 {offsets = [0, 0, 0], sizes = [1, 32, 32], strides = [1, 1, 1]} : vector<3x32x32xf32> to vector<1x32x32xf32>
    %57 = vector.shape_cast %56 : vector<1x32x32xf32> to vector<32x32xf32>
    %cst_31 = arith.constant dense<0.000000e+00> : vector<8x32xf32>
    %58 = tpu.matmul %52, %57, %cst_31 {dimension_numbers = #tpu.dot_dimension_numbers<[1], [0], [0], [1], [0, 0, 1, 1], [], []>} : vector<8x32xf32>, vector<32x32xf32>, vector<8x32xf32> -> vector<8x32xf32>
    %59 = vector.extract_strided_slice %49 {offsets = [1, 0, 0], sizes = [1, 32, 32], strides = [1, 1, 1]} : vector<3x32x32xf32> to vector<1x32x32xf32>
    %60 = vector.shape_cast %59 : vector<1x32x32xf32> to vector<32x32xf32>
    %cst_32 = arith.constant dense<0.000000e+00> : vector<8x32xf32>
    %61 = tpu.matmul %47, %60, %cst_32 {dimension_numbers = #tpu.dot_dimension_numbers<[1], [0], [0], [1], [0, 0, 1, 1], [], []>} : vector<8x32xf32>, vector<32x32xf32>, vector<8x32xf32> -> vector<8x32xf32>
    %62 = arith.addf %58, %61 : vector<8x32xf32>
    %63 = vector.extract_strided_slice %49 {offsets = [2, 0, 0], sizes = [1, 32, 32], strides = [1, 1, 1]} : vector<3x32x32xf32> to vector<1x32x32xf32>
    %64 = vector.shape_cast %63 : vector<1x32x32xf32> to vector<32x32xf32>
    %cst_33 = arith.constant dense<0.000000e+00> : vector<8x32xf32>
    %65 = tpu.matmul %55, %64, %cst_33 {dimension_numbers = #tpu.dot_dimension_numbers<[1], [0], [0], [1], [0, 0, 1, 1], [], []>} : vector<8x32xf32>, vector<32x32xf32>, vector<8x32xf32> -> vector<8x32xf32>
    %66 = arith.addf %62, %65 : vector<8x32xf32>
    %c0_34 = arith.constant 0 : index
    %c0_35 = arith.constant 0 : index
    %c0_36 = arith.constant 0 : index
    %67 = vector.load %arg8[%c0_34, %c0_35, %c0_36] : memref<2x1x32xf32, #tpu.memory_space<vmem>>, vector<1x1x32xf32>
    %68 = vector.shape_cast %67 : vector<1x1x32xf32> to vector<1x32xf32>
    %69 = vector.broadcast %68 : vector<1x32xf32> to vector<8x32xf32>
    %70 = arith.addf %66, %69 : vector<8x32xf32>
    %cst_37 = arith.constant 0.000000e+00 : f32
    %71 = vector.broadcast %cst_37 : f32 to vector<8x32xf32>
    %72 = arith.maximumf %70, %71 : vector<8x32xf32>
    %cst_38 = arith.constant dense<0.000000e+00> : vector<32xf32>
    %73 = vector.multi_reduction <add>, %72, %cst_38 [0] : vector<8x32xf32> to vector<32xf32>
    %74 = vector.shape_cast %73 : vector<32xf32> to vector<1x32xf32>
    %cst_39 = arith.constant 8.000000e+00 : f32
    %75 = vector.broadcast %cst_39 : f32 to vector<1x32xf32>
    %76 = arith.divf %74, %75 : vector<1x32xf32>
    %c0_40 = arith.constant 0 : index
    %c0_41 = arith.constant 0 : index
    %c0_42 = arith.constant 0 : index
    %77 = vector.load %arg9[%c0_40, %c0_41, %c0_42] : memref<2x32x2xf32, #tpu.memory_space<vmem>>, vector<1x32x2xf32>
    %78 = vector.shape_cast %77 : vector<1x32x2xf32> to vector<32x2xf32>
    %cst_43 = arith.constant dense<0.000000e+00> : vector<1x2xf32>
    %79 = tpu.matmul %76, %78, %cst_43 {dimension_numbers = #tpu.dot_dimension_numbers<[1], [0], [0], [1], [0, 0, 1, 1], [], []>} : vector<1x32xf32>, vector<32x2xf32>, vector<1x2xf32> -> vector<1x2xf32>
    %cst_44 = arith.constant 0.000000e+00 : f32
    %80 = vector.broadcast %cst_44 : f32 to vector<1x2xf32>
    %81 = arith.maximumf %79, %80 : vector<1x2xf32>
    %c0_45 = arith.constant 0 : index
    %c0_46 = arith.constant 0 : index
    %c0_47 = arith.constant 0 : index
    %82 = vector.load %arg10[%c0_45, %c0_46, %c0_47] : memref<2x2x32xf32, #tpu.memory_space<vmem>>, vector<1x2x32xf32>
    %83 = vector.shape_cast %82 : vector<1x2x32xf32> to vector<2x32xf32>
    %cst_48 = arith.constant dense<0.000000e+00> : vector<1x32xf32>
    %84 = tpu.matmul %81, %83, %cst_48 {dimension_numbers = #tpu.dot_dimension_numbers<[1], [0], [0], [1], [0, 0, 1, 1], [], []>} : vector<1x2xf32>, vector<2x32xf32>, vector<1x32xf32> -> vector<1x32xf32>
    %85 = arith.negf %84 : vector<1x32xf32>
    %86 = math.exp %85 : vector<1x32xf32>
    %cst_49 = arith.constant 1.000000e+00 : f32
    %87 = vector.broadcast %cst_49 : f32 to vector<1x32xf32>
    %88 = arith.addf %87, %86 : vector<1x32xf32>
    %89 = arith.divf %87, %88 : vector<1x32xf32>
    %90 = vector.broadcast %89 : vector<1x32xf32> to vector<8x32xf32>
    %91 = arith.mulf %72, %90 : vector<8x32xf32>
    %c0_50 = arith.constant 0 : index
    %c0_51 = arith.constant 0 : index
    %c0_52 = arith.constant 0 : index
    %c0_53 = arith.constant 0 : index
    %92 = vector.load %arg11[%c0_50, %c0_51, %c0_52, %c0_53] : memref<2x3x32x32xf32, #tpu.memory_space<vmem>>, vector<1x3x32x32xf32>
    %93 = vector.shape_cast %92 : vector<1x3x32x32xf32> to vector<3x32x32xf32>
    %c1_i32_54 = arith.constant 1 : i32
    %94 = tpu.dynamic_rotate %91 by %c1_i32_54 dim 0 : vector<8x32xf32>, i32 -> vector<8x32xf32>
    %cst_55 = arith.constant 0.000000e+00 : f32
    %95 = vector.broadcast %cst_55 : f32 to vector<8x32xf32>
    %96 = arith.select %14, %95, %94 : vector<8x32xi1>, vector<8x32xf32>
    %c7_i32_56 = arith.constant 7 : i32
    %97 = tpu.dynamic_rotate %91 by %c7_i32_56 dim 0 : vector<8x32xf32>, i32 -> vector<8x32xf32>
    %cst_57 = arith.constant 0.000000e+00 : f32
    %98 = vector.broadcast %cst_57 : f32 to vector<8x32xf32>
    %99 = arith.select %16, %98, %97 : vector<8x32xi1>, vector<8x32xf32>
    %100 = vector.extract_strided_slice %93 {offsets = [0, 0, 0], sizes = [1, 32, 32], strides = [1, 1, 1]} : vector<3x32x32xf32> to vector<1x32x32xf32>
    %101 = vector.shape_cast %100 : vector<1x32x32xf32> to vector<32x32xf32>
    %cst_58 = arith.constant dense<0.000000e+00> : vector<8x32xf32>
    %102 = tpu.matmul %96, %101, %cst_58 {dimension_numbers = #tpu.dot_dimension_numbers<[1], [0], [0], [1], [0, 0, 1, 1], [], []>} : vector<8x32xf32>, vector<32x32xf32>, vector<8x32xf32> -> vector<8x32xf32>
    %103 = vector.extract_strided_slice %93 {offsets = [1, 0, 0], sizes = [1, 32, 32], strides = [1, 1, 1]} : vector<3x32x32xf32> to vector<1x32x32xf32>
    %104 = vector.shape_cast %103 : vector<1x32x32xf32> to vector<32x32xf32>
    %cst_59 = arith.constant dense<0.000000e+00> : vector<8x32xf32>
    %105 = tpu.matmul %91, %104, %cst_59 {dimension_numbers = #tpu.dot_dimension_numbers<[1], [0], [0], [1], [0, 0, 1, 1], [], []>} : vector<8x32xf32>, vector<32x32xf32>, vector<8x32xf32> -> vector<8x32xf32>
    %106 = arith.addf %102, %105 : vector<8x32xf32>
    %107 = vector.extract_strided_slice %93 {offsets = [2, 0, 0], sizes = [1, 32, 32], strides = [1, 1, 1]} : vector<3x32x32xf32> to vector<1x32x32xf32>
    %108 = vector.shape_cast %107 : vector<1x32x32xf32> to vector<32x32xf32>
    %cst_60 = arith.constant dense<0.000000e+00> : vector<8x32xf32>
    %109 = tpu.matmul %99, %108, %cst_60 {dimension_numbers = #tpu.dot_dimension_numbers<[1], [0], [0], [1], [0, 0, 1, 1], [], []>} : vector<8x32xf32>, vector<32x32xf32>, vector<8x32xf32> -> vector<8x32xf32>
    %110 = arith.addf %106, %109 : vector<8x32xf32>
    %c0_61 = arith.constant 0 : index
    %c0_62 = arith.constant 0 : index
    %c0_63 = arith.constant 0 : index
    %111 = vector.load %arg12[%c0_61, %c0_62, %c0_63] : memref<2x1x32xf32, #tpu.memory_space<vmem>>, vector<1x1x32xf32>
    %112 = vector.shape_cast %111 : vector<1x1x32xf32> to vector<1x32xf32>
    %113 = vector.broadcast %112 : vector<1x32xf32> to vector<8x32xf32>
    %114 = arith.addf %110, %113 : vector<8x32xf32>
    %115 = arith.addf %114, %47 : vector<8x32xf32>
    %cst_64 = arith.constant 0.000000e+00 : f32
    %116 = vector.broadcast %cst_64 : f32 to vector<8x32xf32>
    %117 = arith.maximumf %115, %116 : vector<8x32xf32>
    %118 = vector.extract_strided_slice %7 {offsets = [0, 32], sizes = [8, 32], strides = [1, 1]} : vector<8x64xf32> to vector<8x32xf32>
    %c1 = arith.constant 1 : index
    %c0_65 = arith.constant 0 : index
    %c0_66 = arith.constant 0 : index
    %119 = vector.load %arg6[%c1, %c0_65, %c0_66] : memref<2x32x2xf32, #tpu.memory_space<vmem>>, vector<1x32x2xf32>
    %120 = vector.shape_cast %119 : vector<1x32x2xf32> to vector<32x2xf32>
    %cst_67 = arith.constant dense<0.000000e+00> : vector<8x2xf32>
    %121 = tpu.matmul %118, %120, %cst_67 {dimension_numbers = #tpu.dot_dimension_numbers<[1], [0], [0], [1], [0, 0, 1, 1], [], []>} : vector<8x32xf32>, vector<32x2xf32>, vector<8x2xf32> -> vector<8x2xf32>
    %122 = vector.extract_strided_slice %121 {offsets = [0, 0], sizes = [8, 1], strides = [1, 1]} : vector<8x2xf32> to vector<8x1xf32>
    %123 = vector.extract_strided_slice %121 {offsets = [0, 1], sizes = [8, 1], strides = [1, 1]} : vector<8x2xf32> to vector<8x1xf32>
    %124 = tpu.transpose %123, [1, 0] : vector<8x1xf32> -> vector<1x8xf32>
    %125 = vector.broadcast %122 : vector<8x1xf32> to vector<8x8xf32>
    %126 = vector.broadcast %124 : vector<1x8xf32> to vector<8x8xf32>
    %127 = arith.addf %125, %126 : vector<8x8xf32>
    %128 = vector.extract_strided_slice %11 {offsets = [0, 1], sizes = [64, 1], strides = [1, 1]} : vector<64x2xf32> to vector<64x1xf32>
    %129 = vector.shape_cast %128 : vector<64x1xf32> to vector<8x8xf32>
    %130 = arith.addf %127, %129 : vector<8x8xf32>
    %cst_68 = arith.constant 0.000000e+00 : f32
    %131 = vector.broadcast %cst_68 : f32 to vector<8x8xf32>
    %132 = arith.cmpf ogt, %130, %131 : vector<8x8xf32>
    %cst_69 = arith.constant 2.000000e-01 : f32
    %133 = vector.broadcast %cst_69 : f32 to vector<8x8xf32>
    %134 = arith.mulf %133, %130 : vector<8x8xf32>
    %135 = arith.select %132, %130, %134 : vector<8x8xi1>, vector<8x8xf32>
    %cst_70 = arith.constant -9.000000e+15 : f32
    %136 = vector.broadcast %cst_70 : f32 to vector<8x8xf32>
    %137 = arith.select %5, %135, %136 : vector<8x8xi1>, vector<8x8xf32>
    %cst_71 = arith.constant dense<0xFF800000> : vector<8xf32>
    %138 = vector.multi_reduction <maximumf>, %137, %cst_71 [1] : vector<8x8xf32> to vector<8xf32>
    %139 = vector.shape_cast %138 : vector<8xf32> to vector<8x1xf32>
    %140 = vector.broadcast %139 : vector<8x1xf32> to vector<8x8xf32>
    %141 = arith.subf %137, %140 : vector<8x8xf32>
    %142 = math.exp %141 : vector<8x8xf32>
    %cst_72 = arith.constant dense<0.000000e+00> : vector<8xf32>
    %143 = vector.multi_reduction <add>, %142, %cst_72 [1] : vector<8x8xf32> to vector<8xf32>
    %144 = vector.shape_cast %143 : vector<8xf32> to vector<8x1xf32>
    %145 = tpu.reciprocal %144 : vector<8x1xf32> -> vector<8x1xf32>
    %146 = vector.broadcast %145 : vector<8x1xf32> to vector<8x8xf32>
    %147 = arith.mulf %142, %146 : vector<8x8xf32>
    %cst_73 = arith.constant dense<0.000000e+00> : vector<8x32xf32>
    %148 = tpu.matmul %147, %118, %cst_73 {dimension_numbers = #tpu.dot_dimension_numbers<[1], [0], [0], [1], [0, 0, 1, 1], [], []>} : vector<8x8xf32>, vector<8x32xf32>, vector<8x32xf32> -> vector<8x32xf32>
    %c1_74 = arith.constant 1 : index
    %c0_75 = arith.constant 0 : index
    %c0_76 = arith.constant 0 : index
    %c0_77 = arith.constant 0 : index
    %149 = vector.load %arg7[%c1_74, %c0_75, %c0_76, %c0_77] : memref<2x3x32x32xf32, #tpu.memory_space<vmem>>, vector<1x3x32x32xf32>
    %150 = vector.shape_cast %149 : vector<1x3x32x32xf32> to vector<3x32x32xf32>
    %c1_i32_78 = arith.constant 1 : i32
    %151 = tpu.dynamic_rotate %148 by %c1_i32_78 dim 0 : vector<8x32xf32>, i32 -> vector<8x32xf32>
    %cst_79 = arith.constant 0.000000e+00 : f32
    %152 = vector.broadcast %cst_79 : f32 to vector<8x32xf32>
    %153 = arith.select %14, %152, %151 : vector<8x32xi1>, vector<8x32xf32>
    %c7_i32_80 = arith.constant 7 : i32
    %154 = tpu.dynamic_rotate %148 by %c7_i32_80 dim 0 : vector<8x32xf32>, i32 -> vector<8x32xf32>
    %cst_81 = arith.constant 0.000000e+00 : f32
    %155 = vector.broadcast %cst_81 : f32 to vector<8x32xf32>
    %156 = arith.select %16, %155, %154 : vector<8x32xi1>, vector<8x32xf32>
    %157 = vector.extract_strided_slice %150 {offsets = [0, 0, 0], sizes = [1, 32, 32], strides = [1, 1, 1]} : vector<3x32x32xf32> to vector<1x32x32xf32>
    %158 = vector.shape_cast %157 : vector<1x32x32xf32> to vector<32x32xf32>
    %cst_82 = arith.constant dense<0.000000e+00> : vector<8x32xf32>
    %159 = tpu.matmul %153, %158, %cst_82 {dimension_numbers = #tpu.dot_dimension_numbers<[1], [0], [0], [1], [0, 0, 1, 1], [], []>} : vector<8x32xf32>, vector<32x32xf32>, vector<8x32xf32> -> vector<8x32xf32>
    %160 = vector.extract_strided_slice %150 {offsets = [1, 0, 0], sizes = [1, 32, 32], strides = [1, 1, 1]} : vector<3x32x32xf32> to vector<1x32x32xf32>
    %161 = vector.shape_cast %160 : vector<1x32x32xf32> to vector<32x32xf32>
    %cst_83 = arith.constant dense<0.000000e+00> : vector<8x32xf32>
    %162 = tpu.matmul %148, %161, %cst_83 {dimension_numbers = #tpu.dot_dimension_numbers<[1], [0], [0], [1], [0, 0, 1, 1], [], []>} : vector<8x32xf32>, vector<32x32xf32>, vector<8x32xf32> -> vector<8x32xf32>
    %163 = arith.addf %159, %162 : vector<8x32xf32>
    %164 = vector.extract_strided_slice %150 {offsets = [2, 0, 0], sizes = [1, 32, 32], strides = [1, 1, 1]} : vector<3x32x32xf32> to vector<1x32x32xf32>
    %165 = vector.shape_cast %164 : vector<1x32x32xf32> to vector<32x32xf32>
    %cst_84 = arith.constant dense<0.000000e+00> : vector<8x32xf32>
    %166 = tpu.matmul %156, %165, %cst_84 {dimension_numbers = #tpu.dot_dimension_numbers<[1], [0], [0], [1], [0, 0, 1, 1], [], []>} : vector<8x32xf32>, vector<32x32xf32>, vector<8x32xf32> -> vector<8x32xf32>
    %167 = arith.addf %163, %166 : vector<8x32xf32>
    %c1_85 = arith.constant 1 : index
    %c0_86 = arith.constant 0 : index
    %c0_87 = arith.constant 0 : index
    %168 = vector.load %arg8[%c1_85, %c0_86, %c0_87] : memref<2x1x32xf32, #tpu.memory_space<vmem>>, vector<1x1x32xf32>
    %169 = vector.shape_cast %168 : vector<1x1x32xf32> to vector<1x32xf32>
    %170 = vector.broadcast %169 : vector<1x32xf32> to vector<8x32xf32>
    %171 = arith.addf %167, %170 : vector<8x32xf32>
    %cst_88 = arith.constant 0.000000e+00 : f32
    %172 = vector.broadcast %cst_88 : f32 to vector<8x32xf32>
    %173 = arith.maximumf %171, %172 : vector<8x32xf32>
    %cst_89 = arith.constant dense<0.000000e+00> : vector<32xf32>
    %174 = vector.multi_reduction <add>, %173, %cst_89 [0] : vector<8x32xf32> to vector<32xf32>
    %175 = vector.shape_cast %174 : vector<32xf32> to vector<1x32xf32>
    %cst_90 = arith.constant 8.000000e+00 : f32
    %176 = vector.broadcast %cst_90 : f32 to vector<1x32xf32>
    %177 = arith.divf %175, %176 : vector<1x32xf32>
    %c1_91 = arith.constant 1 : index
    %c0_92 = arith.constant 0 : index
    %c0_93 = arith.constant 0 : index
    %178 = vector.load %arg9[%c1_91, %c0_92, %c0_93] : memref<2x32x2xf32, #tpu.memory_space<vmem>>, vector<1x32x2xf32>
    %179 = vector.shape_cast %178 : vector<1x32x2xf32> to vector<32x2xf32>
    %cst_94 = arith.constant dense<0.000000e+00> : vector<1x2xf32>
    %180 = tpu.matmul %177, %179, %cst_94 {dimension_numbers = #tpu.dot_dimension_numbers<[1], [0], [0], [1], [0, 0, 1, 1], [], []>} : vector<1x32xf32>, vector<32x2xf32>, vector<1x2xf32> -> vector<1x2xf32>
    %cst_95 = arith.constant 0.000000e+00 : f32
    %181 = vector.broadcast %cst_95 : f32 to vector<1x2xf32>
    %182 = arith.maximumf %180, %181 : vector<1x2xf32>
    %c1_96 = arith.constant 1 : index
    %c0_97 = arith.constant 0 : index
    %c0_98 = arith.constant 0 : index
    %183 = vector.load %arg10[%c1_96, %c0_97, %c0_98] : memref<2x2x32xf32, #tpu.memory_space<vmem>>, vector<1x2x32xf32>
    %184 = vector.shape_cast %183 : vector<1x2x32xf32> to vector<2x32xf32>
    %cst_99 = arith.constant dense<0.000000e+00> : vector<1x32xf32>
    %185 = tpu.matmul %182, %184, %cst_99 {dimension_numbers = #tpu.dot_dimension_numbers<[1], [0], [0], [1], [0, 0, 1, 1], [], []>} : vector<1x2xf32>, vector<2x32xf32>, vector<1x32xf32> -> vector<1x32xf32>
    %186 = arith.negf %185 : vector<1x32xf32>
    %187 = math.exp %186 : vector<1x32xf32>
    %cst_100 = arith.constant 1.000000e+00 : f32
    %188 = vector.broadcast %cst_100 : f32 to vector<1x32xf32>
    %189 = arith.addf %188, %187 : vector<1x32xf32>
    %190 = arith.divf %188, %189 : vector<1x32xf32>
    %191 = vector.broadcast %190 : vector<1x32xf32> to vector<8x32xf32>
    %192 = arith.mulf %173, %191 : vector<8x32xf32>
    %c1_101 = arith.constant 1 : index
    %c0_102 = arith.constant 0 : index
    %c0_103 = arith.constant 0 : index
    %c0_104 = arith.constant 0 : index
    %193 = vector.load %arg11[%c1_101, %c0_102, %c0_103, %c0_104] : memref<2x3x32x32xf32, #tpu.memory_space<vmem>>, vector<1x3x32x32xf32>
    %194 = vector.shape_cast %193 : vector<1x3x32x32xf32> to vector<3x32x32xf32>
    %c1_i32_105 = arith.constant 1 : i32
    %195 = tpu.dynamic_rotate %192 by %c1_i32_105 dim 0 : vector<8x32xf32>, i32 -> vector<8x32xf32>
    %cst_106 = arith.constant 0.000000e+00 : f32
    %196 = vector.broadcast %cst_106 : f32 to vector<8x32xf32>
    %197 = arith.select %14, %196, %195 : vector<8x32xi1>, vector<8x32xf32>
    %c7_i32_107 = arith.constant 7 : i32
    %198 = tpu.dynamic_rotate %192 by %c7_i32_107 dim 0 : vector<8x32xf32>, i32 -> vector<8x32xf32>
    %cst_108 = arith.constant 0.000000e+00 : f32
    %199 = vector.broadcast %cst_108 : f32 to vector<8x32xf32>
    %200 = arith.select %16, %199, %198 : vector<8x32xi1>, vector<8x32xf32>
    %201 = vector.extract_strided_slice %194 {offsets = [0, 0, 0], sizes = [1, 32, 32], strides = [1, 1, 1]} : vector<3x32x32xf32> to vector<1x32x32xf32>
    %202 = vector.shape_cast %201 : vector<1x32x32xf32> to vector<32x32xf32>
    %cst_109 = arith.constant dense<0.000000e+00> : vector<8x32xf32>
    %203 = tpu.matmul %197, %202, %cst_109 {dimension_numbers = #tpu.dot_dimension_numbers<[1], [0], [0], [1], [0, 0, 1, 1], [], []>} : vector<8x32xf32>, vector<32x32xf32>, vector<8x32xf32> -> vector<8x32xf32>
    %204 = vector.extract_strided_slice %194 {offsets = [1, 0, 0], sizes = [1, 32, 32], strides = [1, 1, 1]} : vector<3x32x32xf32> to vector<1x32x32xf32>
    %205 = vector.shape_cast %204 : vector<1x32x32xf32> to vector<32x32xf32>
    %cst_110 = arith.constant dense<0.000000e+00> : vector<8x32xf32>
    %206 = tpu.matmul %192, %205, %cst_110 {dimension_numbers = #tpu.dot_dimension_numbers<[1], [0], [0], [1], [0, 0, 1, 1], [], []>} : vector<8x32xf32>, vector<32x32xf32>, vector<8x32xf32> -> vector<8x32xf32>
    %207 = arith.addf %203, %206 : vector<8x32xf32>
    %208 = vector.extract_strided_slice %194 {offsets = [2, 0, 0], sizes = [1, 32, 32], strides = [1, 1, 1]} : vector<3x32x32xf32> to vector<1x32x32xf32>
    %209 = vector.shape_cast %208 : vector<1x32x32xf32> to vector<32x32xf32>
    %cst_111 = arith.constant dense<0.000000e+00> : vector<8x32xf32>
    %210 = tpu.matmul %200, %209, %cst_111 {dimension_numbers = #tpu.dot_dimension_numbers<[1], [0], [0], [1], [0, 0, 1, 1], [], []>} : vector<8x32xf32>, vector<32x32xf32>, vector<8x32xf32> -> vector<8x32xf32>
    %211 = arith.addf %207, %210 : vector<8x32xf32>
    %c1_112 = arith.constant 1 : index
    %c0_113 = arith.constant 0 : index
    %c0_114 = arith.constant 0 : index
    %212 = vector.load %arg12[%c1_112, %c0_113, %c0_114] : memref<2x1x32xf32, #tpu.memory_space<vmem>>, vector<1x1x32xf32>
    %213 = vector.shape_cast %212 : vector<1x1x32xf32> to vector<1x32xf32>
    %214 = vector.broadcast %213 : vector<1x32xf32> to vector<8x32xf32>
    %215 = arith.addf %211, %214 : vector<8x32xf32>
    %216 = arith.addf %215, %148 : vector<8x32xf32>
    %cst_115 = arith.constant 0.000000e+00 : f32
    %217 = vector.broadcast %cst_115 : f32 to vector<8x32xf32>
    %218 = arith.maximumf %216, %217 : vector<8x32xf32>
    %219 = tpu.concatenate %117, %218 in 1 : vector<8x32xf32>, vector<8x32xf32> -> vector<8x64xf32>
    %c0_116 = arith.constant 0 : index
    %c0_117 = arith.constant 0 : index
    %c0_118 = arith.constant 0 : index
    %220 = vector.load %arg13[%c0_116, %c0_117, %c0_118] : memref<1x8x64xf32, #tpu.memory_space<vmem>>, vector<1x8x64xf32>
    %221 = vector.shape_cast %220 : vector<1x8x64xf32> to vector<8x64xf32>
    %222 = vector.shape_cast %219 : vector<8x64xf32> to vector<1x8x64xf32>
    tpu.vector_store %arg13[%c0_116, %c0_117, %c0_118], %222 {strides = array<i32>} : memref<1x8x64xf32, #tpu.memory_space<vmem>>, vector<1x8x64xf32>,
    return
  }
  func.func @transform_0(%arg0: i32) -> (i32, i32, i32) {
    %c0_i32 = arith.constant 0 : i32
    %c0_i32_0 = arith.constant 0 : i32
    %c0_i32_1 = arith.constant 0 : i32
    return %arg0, %c0_i32, %c0_i32_0 : i32, i32, i32
  }
  func.func @transform_1(%arg0: i32) -> (i32, i32, i32) {
    %c0_i32 = arith.constant 0 : i32
    %c0_i32_0 = arith.constant 0 : i32
    %c0_i32_1 = arith.constant 0 : i32
    return %arg0, %c0_i32, %c0_i32_0 : i32, i32, i32
  }
  func.func @transform_2(%arg0: i32) -> (i32, i32, i32) {
    %c0_i32 = arith.constant 0 : i32
    %c0_i32_0 = arith.constant 0 : i32
    %c0_i32_1 = arith.constant 0 : i32
    return %arg0, %c0_i32, %c0_i32_0 : i32, i32, i32
  }
  func.func @transform_3(%arg0: i32) -> (i32, i32) {
    %c0_i32 = arith.constant 0 : i32
    %c0_i32_0 = arith.constant 0 : i32
    %c0_i32_1 = arith.constant 0 : i32
    return %c0_i32, %c0_i32_0 : i32, i32
  }
  func.func @transform_4(%arg0: i32) -> (i32, i32) {
    %c0_i32 = arith.constant 0 : i32
    %c0_i32_0 = arith.constant 0 : i32
    %c0_i32_1 = arith.constant 0 : i32
    return %c0_i32, %c0_i32_0 : i32, i32
  }
  func.func @transform_5(%arg0: i32) -> (i32, i32, i32) {
    %c0_i32 = arith.constant 0 : i32
    %c0_i32_0 = arith.constant 0 : i32
    %c0_i32_1 = arith.constant 0 : i32
    %c0_i32_2 = arith.constant 0 : i32
    return %c0_i32, %c0_i32_0, %c0_i32_1 : i32, i32, i32
  }
  func.func @transform_6(%arg0: i32) -> (i32, i32, i32, i32) {
    %c0_i32 = arith.constant 0 : i32
    %c0_i32_0 = arith.constant 0 : i32
    %c0_i32_1 = arith.constant 0 : i32
    %c0_i32_2 = arith.constant 0 : i32
    %c0_i32_3 = arith.constant 0 : i32
    return %c0_i32, %c0_i32_0, %c0_i32_1, %c0_i32_2 : i32, i32, i32, i32
  }
  func.func @transform_7(%arg0: i32) -> (i32, i32, i32) {
    %c0_i32 = arith.constant 0 : i32
    %c0_i32_0 = arith.constant 0 : i32
    %c0_i32_1 = arith.constant 0 : i32
    %c0_i32_2 = arith.constant 0 : i32
    return %c0_i32, %c0_i32_0, %c0_i32_1 : i32, i32, i32
  }
  func.func @transform_8(%arg0: i32) -> (i32, i32, i32) {
    %c0_i32 = arith.constant 0 : i32
    %c0_i32_0 = arith.constant 0 : i32
    %c0_i32_1 = arith.constant 0 : i32
    %c0_i32_2 = arith.constant 0 : i32
    return %c0_i32, %c0_i32_0, %c0_i32_1 : i32, i32, i32
  }
  func.func @transform_9(%arg0: i32) -> (i32, i32, i32) {
    %c0_i32 = arith.constant 0 : i32
    %c0_i32_0 = arith.constant 0 : i32
    %c0_i32_1 = arith.constant 0 : i32
    %c0_i32_2 = arith.constant 0 : i32
    return %c0_i32, %c0_i32_0, %c0_i32_1 : i32, i32, i32
  }
  func.func @transform_10(%arg0: i32) -> (i32, i32, i32, i32) {
    %c0_i32 = arith.constant 0 : i32
    %c0_i32_0 = arith.constant 0 : i32
    %c0_i32_1 = arith.constant 0 : i32
    %c0_i32_2 = arith.constant 0 : i32
    %c0_i32_3 = arith.constant 0 : i32
    return %c0_i32, %c0_i32_0, %c0_i32_1, %c0_i32_2 : i32, i32, i32, i32
  }
  func.func @transform_11(%arg0: i32) -> (i32, i32, i32) {
    %c0_i32 = arith.constant 0 : i32
    %c0_i32_0 = arith.constant 0 : i32
    %c0_i32_1 = arith.constant 0 : i32
    %c0_i32_2 = arith.constant 0 : i32
    return %c0_i32, %c0_i32_0, %c0_i32_1 : i32, i32, i32
  }
  func.func @transform_12(%arg0: i32) -> (i32, i32, i32) {
    %c0_i32 = arith.constant 0 : i32
    %c0_i32_0 = arith.constant 0 : i32
    %c0_i32_1 = arith.constant 0 : i32
    return %arg0, %c0_i32, %c0_i32_0 : i32, i32, i32
  }
}

</mosaic_0001>

<bundles_post_ra>
// kernel: tpu_custom_call.1
= control target key start
LH: loop header
LB: loop body
LE: loop exit
PB: predicated region body
PF: predicated region fallthrough
CT: control target
= control target key end

     0   :  { %s4003_s0 = inlined_call_operand.vmem [shape: f32[2,8,16], index: 0, kind: input, shape index: {}]   ;;  %s4004_s1 = inlined_call_operand.vmem [shape: f32[2,64,8], index: 1, kind: input, shape index: {}]   ;;  %s4005_s2 = inlined_call_operand.vmem [shape: f32[2,8,8], index: 2, kind: input, shape index: {}]   ;;  %s4006_s3 = inlined_call_operand.vmem [shape: f32[16,64], index: 3, kind: input, shape index: {}]   ;;  %s4007_s4 = inlined_call_operand.vmem [shape: f32[8,2], index: 4, kind: input, shape index: {}]   ;;  %s4008_s5 = inlined_call_operand.vmem [shape: f32[2,32,2], index: 5, kind: input, shape index: {}]   ;;  %s4009_s6 = inlined_call_operand.vmem [shape: f32[2,3,32,32], index: 6, kind: input, shape index: {}]   ;;  %s4010_s7 = inlined_call_operand.vmem [shape: f32[2,1,32], index: 7, kind: input, shape index: {}]   ;;  %s4011_s8 = inlined_call_operand.vmem [shape: f32[2,32,2], index: 8, kind: input, shape index: {}]   ;;  %s4012_s9 = inlined_call_operand.vmem [shape: f32[2,2,32], index: 9, kind: input, shape index: {}]   ;;  %s4013_s10 = inlined_call_operand.hbm [shape: f32[2,3,32,32], index: 10, kind: input, shape index: {}]   ;;  %s4014_s11 = inlined_call_operand.vmem [shape: f32[2,1,32], index: 11, kind: input, shape index: {}]   ;;  %s4015_s12 = inlined_call_operand.hbm [shape: f32[2,8,64], index: 12, kind: output, shape index: {}]  }
   0x1   :  { %4024 = sst [smem:[#allocation13_spill]] %s4013_s10 }
   0x2   :  { %17 = vsyncpa [#allocation3], 0 }
   0x3   :  { %18 = vsyncpa [#allocation4], 0 }
   0x4   :  { %20 = vsyncpa [#allocation4 + $0x1], 0  ;;  %s3457_s21 = smov 0   ;;  %s3459_s22 = smov 0  }
   0x5   :  { %s3461_s23 = smov 0   ;;  %s3463_s24 = smov 0  }
   0x6 LB: > { %4025 = sst [smem:[#allocation8_spill]] %s3366_s21  ;;  %s3478_s25 = sadd.s32 4294967295, %s3378_s24   ;;  %s3378_s24 = sphi %s3463_s24, %s4042_s24   ;;  %s3374_s23 = sphi %s3461_s23, %s4044_s23   ;;  %s3370_s22 = sphi %s3459_s22, %s4046_s22   ;;  %s3366_s21 = sphi %s3457_s21, %s4045_s21  }
   0x7   : > { %4026 = sst [smem:[#allocation9_spill]] %s3374_s23  ;;  %s2709_s26 = sadd.s32 4294967294, %s3378_s24  }
   0x8   : > { %s3482_s27 = sadd.s32 1, %s3378_s24   ;;  %s300_s28 = sadd.s32 1, %s3374_s23 }
   0x9   : > { %4027 = sst [smem:[#allocation10_spill]] %s3482_s27  ;;  %s297_s29 = ssub.s32 %s3378_s24, %s3482_s27 }
   0xa   : > { %p310_p0 = scmp.ne.s32.totalorder %s3374_s23, %s3370_s22  ;;  %p298_p1 = scmp.eq.s32.totalorder %s297_s29, 0 }
   0xb   : > { %p311_p2 = scmp.eq.s32.totalorder %s3478_s25, 1  ;;  %p316_p3 = scmp.ne.s32.totalorder %s3370_s22, %s3366_s21 }
   0xc   : > { %p317_p4 = scmp.eq.s32.totalorder %s2709_s26, 1  ;;  %p2710_p7 = scmp.ge.s32.totalorder %s3378_s24, 1 }
   0xd   : > { %s3493_s30 = scalar_select %p298_p1, %s3374_s23, %s300_s28  }
   0xe   : > { %p3495_p5 = por %p311_p2, %p310_p0  ;;  %p3499_p6 = por %p317_p4, %p316_p3 }
   0xf   : > { %4028 = sst [smem:[#allocation11_spill]] %s3493_s30  ;;  %p324_p8 = scmp.lt.s32.totalorder %s3378_s24, 3 }
  0x10   : > { %s4029_s13 = scalar_select %p3495_p5, 1, 0 }
  0x11   : > { %s4030_s14 = scalar_select %p3499_p6, 1, 0 }
  0x12   : > { %p4017_p9 = scmp.eq.s32.totalorder %s3478_s25, 0  ;;  %p3506_p10 = pnand %p2710_p7, %p324_p8 }
  0x13   : > { %4031 = sst [smem:[#allocation12_spill]] %s4030_s14  ;;  %s3380_s16 = smov [#allocation2]  }
  0x14   : > { %s4032_s15 = scalar_select %p3506_p10, 1, 0 }
  0x15   : > { %s357_s17 = sshll.u32 %s3380_s16, 4  ;;  %p3209_p11 = pneg %p3506_p10  ;;  %s358_s17 = int_to_ptr.vmem [resolvable:$true] %s357_s17 }
  0x16   : > { %s4034_s10 = sld [smem:[#allocation13_spill]] }
  0x17   : > { %p3514_p12 = pnand %p4017_p9, %p3209_p11 }
  0x19   : > { %p3286_p0 = pneg %p3514_p12 }
  0x1c   : > { %s3284_s26 = scalar_lea.hbm %s4034_s10, 3072 }
  0x1d   : > { %p3285_p13 = scmp.ne.s32.totalorder %s4034_s10, %s3284_s26  ;;  %p3291_p3 = scmp.lt.u32.totalorder %s3284_s26, %s4034_s10 }
  0x1f   : > { %p3287_p1 = pnand %p3286_p0, %p3285_p13 }
  0x21   : > { %p3288_p2 = pneg %p3287_p1 }
  0x23   : > { %p3293_p4 = pnand %p3291_p3, %p3288_p2 }
  0x25   : > { %3296 = shalt.err (!%p3293_p4)
}
  0x26   : > { %s3297_s23 = scalar_lea.vmem %s358_s17, 3072  ;;  %p3305_p9 = scmp.lt.s32.totalorder %s358_s17, %s358_s17 }
  0x27   : > { %p3298_p7 = scmp.ne.s32.totalorder %s358_s17, %s3297_s23  ;;  %p3306_p6 = scmp.lt.s32.totalorder %s3297_s23, %s3297_s23 }
  0x29   : > { %p3300_p8 = pnand %p3298_p7, %p3286_p0  ;;  %p3307_p5 = por %p3306_p6, %p3305_p9 }
  0x2b   : > { %p3301_p11 = pneg %p3300_p8 }
  0x2d   : > { %p3308_p10 = pnand %p3307_p5, %p3301_p11 }
  0x2f   : > { %3311 = shalt.err (!%p3308_p10)
}
  0x30   : > { %s3381_s19 = smov 128   ;;  %s3382_s20 = smov 8  }
  0x31   : > { %3212 = dma.hbm_to_vmem [thread:$0]  (!%p3514_p12), %s4034_s10, 3072, %s358_s17, [#allocation3], %s3381_s19, %s3381_s19, %s3382_s20  }
  0x32   : > { %p4035_p13 = scmp.ne.s32.totalorder %s4032_s15, 0 }
  0x33   : > { %p4036_p1 = scmp.eq.s32.totalorder (!%p4035_p13), %s3478_s25, 0 }
  0x34   : > { %398 = sbr.rel (%p4035_p13) target bundleno = 4026 (0xfba), region = 68 }
  0x3b   : > { %3357 = dma.done.wait (%p4036_p1), [#allocation3], 3072   ;;  %p4037_p0 = pmov %p4036_p1 }
  0x3c   : > { %p448_p5 = scmp.lt.s32.totalorder %s3478_s25, 1  ;;  %v3383_v0 = vmov 0.0|0.0   ;;  %vm3384_vm0 = vmmov 0   ;;  %v3385_v1 = vmov 0.0   ;;  %v464_v2 = vld [vmem:[%s4006_s3] sm:$0xff]  ;;  %v465_v3 = vld [vmem:[%s4006_s3 + $0x8] sm:$0xff]  ;;  %v679_v35 = vlaneseq }
  0x3d   : > { %3359 = vsyncadd (%p4037_p0), [#allocation3], 4294964224  ;;  %3102 = vmatprep.subr.bf16.mxu0 %v3383_v0  ;;  %2889 = vmatprep.mubr.msk.f32.mxu0 %vm3384_vm0, %v3385_v1  ;;  %v3103_v4 = vpack.c.bf16 %v465_v3, %v464_v2  ;;  %v548_v5 = vld [vmem:[%s4007_s4] sm:$0xff]  ;;  %vm466_vm1 = vcmask 130048   ;;  %vm549_vm2 = vcmask 64512   ;;  %v684_v9 = vld [vmem:[%s4008_s5 + $0x8] sm:$0xff] }
  0x3e   : > { %s3545_s23 = scalar_select %p448_p5, %s3478_s25, 1  ;;  %3201 = vmatprep.subr.mxu1 %v548_v5  ;;  %v683_v8 = vld [vmem:[%s4008_s5] sm:$0xff]  ;;  %v685_v13 = vld [vmem:[%s4008_s5 + $0x10] sm:$0xff]  ;;  %v686_v14 = vld [vmem:[%s4008_s5 + $0x18] sm:$0xff]  ;;  %v3386_v20 = vmov 0   ;;  %vm687_vm3 = vcmask 261120  }
  0x3f   : > { %3104 = vmatpush3.bf16.msra.mxu0 %v3103_v4  ;;  %3202 = vmatpush3.msra.mxu1 %v548_v5  ;;  %v3106_v11 = vpack.c.bf16 %v684_v9, %v683_v8  ;;  %v3109_v16 = vpack.c.bf16 %v686_v14, %v685_v13  ;;  %v3639_v37 = vshrl.u32 %v679_v35, 7  ;;  %v839_v38 = vand.u32 127, %v679_v35  ;;  %s3390_s20 = smov 32   ;;  %p4038_p9 = scmp.ne.s32.totalorder %s4029_s13, 0 }
  0x40   : > { %s2716_s30 = sshll.u32 %s3545_s23, 3  ;;  %s2784_s15 = sshll.u32 %s3545_s23, 6  ;;  %2892 = vmatprep.subr.mxu0 %v548_v5  ;;  %3111 = vmatprep.subr.bf16.mxu1 %v3383_v0  ;;  %vm872_vm4 = vcmask 1041409   ;;  %vm874_vm5 = vcmask 1042434   ;;  %vm876_vm6 = vcmask 1043459   ;;  %vm878_vm7 = vcmask 1044484  }
  0x41   : > { %s451_s28 = scalar_lea.vmem %s4003_s0, %s2716_s30  ;;  %s3563_s27 = scalar_lea.vmem %s4004_s1, %s2784_s15  ;;  %3264 = vset.pattern.permute.xlu1 %v3386_v20  ;;  %3263 = vset.pattern.permute.xlu0 %v3386_v20  ;;  %v3642_v41 = vsub.s32 %v839_v38, %v3639_v37  ;;  %vm880_vm8 = vcmask 1045509   ;;  %v3656_v58 = vsub.s32 0, %v3639_v37  ;;  %vm882_vm9 = vcmask 1046534   ;;  %v985_v38 = vld [vmem:[%s4009_s6 + $0x48] sm:$0xff] }
  0x42   : > { %v461_v6 = vld [vmem:[%s451_s28] sm:$0xff]  ;;  %v541_v10 = vld [vmem:[%s3563_s27 + $0x8] sm:$0xff]  ;;  %v542_v12 = vld [vmem:[%s3563_s27 + $0x10] sm:$0xff]  ;;  %vm884_vm10 = vcmask 1047559   ;;  %s460_s28 = scalar_lea.vmem %s4005_s2, %s2716_s30  ;;  %s3389_s23 = smov 96   ;;  %vm681_vm13 = vcmp.eq.s32.totalorder %v3639_v37, 0 }
  0x43   : > { %v540_v7 = vld [vmem:[%s3563_s27] sm:$0xff]  ;;  %2890 = vmatmul.mubr.msk.f32.vlgmr.msra.gmra.mrb[0].mxu0 %vm466_vm1, %v461_v6  ;;  %v543_v15 = vld [vmem:[%s3563_s27 + $0x18] sm:$0xff]  ;;  %v545_v18 = vld [vmem:[%s3563_s27 + $0x28] sm:$0xff]  ;;  %vm682_vm14 = vcmp.eq.s32.totalorder %v3639_v37, 7  ;;  %vm1313_vm15 = vcmask 1041408   ;;  %vm1309_vm1 = vcmask 15360  }
  0x44   : > { %2893 = vmatpush3.msra.mxu0 %v548_v5  ;;  %2894 = vmatprep.mubr.msk.f32.mxu0 %vm549_vm2, %v540_v7  ;;  %v544_v17 = vld [vmem:[%s3563_s27 + $0x20] sm:$0xff]  ;;  %v546_v19 = vld [vmem:[%s3563_s27 + $0x30] sm:$0xff]  ;;  %v547_v21 = vld [vmem:[%s3563_s27 + $0x38] sm:$0xff]  ;;  %s3387_s27 = smov 127   ;;  %s2781_s30 = sshll.u32 %s3478_s25, 7 }
  0x45   : > { %3105 = vmatprep.subr.bf16.mxu0 %v3383_v0  ;;  %2900 = vmatprep.mubr.msk.f32.mxu1 %vm549_vm2, %v544_v17  ;;  %v3668_v5 = vld [vmem:[%s460_s28] sm:$0xff]  ;;  %s445_s28 = sand.u32 1, %s3370_s22   ;;  %s3960_s15 = scalar_lea.hbm %s4015_s12, %s2781_s30 }
  0x46   : > { %2901 = vmatmul.mubr.msk.f32.vlgmr.msra.gmra.mrb[0].mxu1 %vm549_vm2, %v545_v18  ;;  %vm463_vm11 = vcmp.gt.f32.partialorder %v3668_v5, 0.0  ;;  %v980_v17 = vld [vmem:[%s4009_s6 + $0x20] sm:$0xff]  ;;  %v981_v18 = vld [vmem:[%s4009_s6 + $0x28] sm:$0xff]  ;;  %s2601_s25 = scalar_lea.sflag [#allocation4], %s445_s28  ;;  %s3391_s21 = smov [#allocation5]  }
  0x47   : > { %2895 = vmatmul.mubr.msk.f32.vlgmr.msra.gmra.mrb[2].mxu0 %vm549_vm2, %v541_v10  ;;  %2903 = vmatprep.mubr.msk.f32.mxu1 %vm549_vm2, %v546_v19  ;;  %v982_v19 = vld [vmem:[%s4009_s6 + $0x30] sm:$0xff]  ;;  %v2754_v5 = vld [vmem:[%s4009_s6 + $0x88] sm:$0xff]  ;;  %s3316_s14 = sshll.u32 %s3391_s21, 4  ;;  %s3317_s14 = int_to_ptr.vmem [resolvable:$false] %s3316_s14 }
  0x48   : > { %2897 = vmatprep.mubr.msk.f32.mxu0 %vm549_vm2, %v542_v12  ;;  %3107 = vmatpush3.bf16.msra.mxu0 %v3106_v11  ;;  %v3388_v11 = vmov 1   ;;  %s3318_s26 = scalar_lea.vmem %s3317_s14, 256 }
  0x49   : > { %3108 = vmatprep.subr.bf16.mxu0 %v3383_v0 }
  0x4a   : > { %2904 = vmatmul.mubr.msk.f32.gmra.mrb[2].mxu1 %vm549_vm2, %v547_v21  ;;  %v3112_v21 = vpack.c.bf16 %v981_v18, %v980_v17 }
  0x4b   : > { %2898 = vmatmul.mubr.msk.f32.gmra.mrb[4].mxu0 %vm549_vm2, %v543_v15  ;;  %2930 = vmatprep.mubr.msk.f32.mxu1 %vm3384_vm0, %v3385_v1 }
  0x4c   : > { %3110 = vmatpush3.bf16.msra.mxu0 %v3109_v16  ;;  %2914 = vmatprep.mubr.msk.f32.mxu0 %vm3384_vm0, %v3385_v1 }
  0x4d   : > { %2917 = vmatprep.subr.mxu0 %v3385_v1  ;;  %3113 = vmatpush3.bf16.msra.mxu1 %v3112_v21  ;;  %v1403_v21 = vld [vmem:[#allocation2 + $0x28] sm:$0xff] }
  0x4e   : > { %3114 = vmatprep.subr.bf16.mxu1 %v3383_v0 }
 0x116   : > { %v3606_v22 = vpop.f32.mrb[0].mxu0 }
 0x117   : > { %v2891_v23 = vpop.f32.mrb[1].mxu0  ;;  %2915 = vmatmul.mubr.msk.f32.vlgmr.msra.gmra.mrb[6].mxu0 %vm687_vm3, %v3606_v22 }
 0x118   : > { %2918 = vmatpush3.msra.mxu0 %v3606_v22  ;;  %2919 = vmatprep.mubr.msk.f32.mxu0 %vm3384_vm0, %v3385_v1 }
 0x119   : > { %3117 = vmatprep.subr.bf16.mxu0 %v3383_v0  ;;  %v3625_v28 = vpop.f32.mrb[0].mxu1 }
 0x11a   : > { %v3614_v24 = vpop.f32.mrb[2].mxu0  ;;  %v3627_v29 = vpop.f32.mrb[1].mxu1 }
 0x11b   : > { %818 = vperm.xlu1 %3264, %v3614_v24   ;;  %v3617_v25 = vpop.f32.mrb[3].mxu0 }
 0x11d   : > { %v3630_v30 = vpop.f32.mrb[2].mxu1 }
 0x11e   : > { %v3619_v26 = vpop.f32.mrb[4].mxu0  ;;  %v3632_v31 = vpop.f32.mrb[3].mxu1 }
 0x11f   : > { %v3621_v27 = vpop.f32.mrb[5].mxu0 }
 0x120   : > { %821 = vperm.xlu1 %3264, %v3621_v27  }
 0x124   : > { %824 = vperm.xlu1 %3264, %v3619_v26  }
 0x128   : > { %830 = vperm.xlu1 %3264, %v3625_v28  }
 0x12c   : > { %836 = vperm.xlu1 %3264, %v3630_v30  }
 0x19a   : > { %v819_v36 = vpop.permute.xlu1 %818 }
 0x19b   : > { %v847_v43 = vrot.slane %v819_v36, %v3642_v41  ;;  %v984_v36 = vld [vmem:[%s4009_s6 + $0x40] sm:$0xff] }
 0x19f   : > { %v822_v39 = vpop.permute.xlu1 %821 }
 0x1a0   : > { %v851_v47 = vrot.slane %v822_v39, %v3642_v41  ;;  %v3124_v39 = vpack.c.bf16 %v985_v38, %v984_v36 }
 0x1a3   : > { %v825_v44 = vpop.permute.xlu1 %824 }
 0x1a4   : > { %v855_v50 = vrot.slane %v825_v44, %v3642_v41 }
 0x1a7   : > { %v831_v48 = vpop.permute.xlu1 %830 }
 0x1a8   : > { %v863_v54 = vrot.slane %v831_v48, %v3642_v41 }
 0x1ab   : > { %v837_v55 = vpop.permute.xlu1 %836 }
 0x1ac   : > { %v871_v60 = vrot.slane %v837_v55, %v3642_v41 }
 0x1ea   : > { %v757_v32 = vpop.f32.mrb[6].mxu0 }
 0x1eb   : > { %762 = vrot.lane.b32.xlu0 %v757_v32, %s3387_s27  ;;  %v2916_v33 = vpop.f32.mrb[7].mxu0 }
 0x1ec   : > { %v978_v33 = vld [vmem:[%s4009_s6 + $0x10] sm:$0xff] }
 0x1ef   : > { %815 = vperm.xlu0 %3263, %v3617_v25  }
 0x1f3   : > { %827 = vperm.xlu0 %3263, %v3627_v29  }
 0x1f7   : > { %833 = vperm.xlu0 %3263, %v3632_v31  }
 0x1fb   : > { %798 = vperm.xlu0 %3263, %v757_v32  }
 0x1ff   : > { %3265 = vset.pattern.permute.xlu0 %v3388_v11 }
 0x25d   : > { %v763_v34 = vpop.permute.xlu0 %762 }
 0x25e   : > { %765 = vxpose.xlu1.b32.start.end [1/1] (short) (narrow) %v763_v34, 8  ;;  %v979_v34 = vld [vmem:[%s4009_s6 + $0x18] sm:$0xff] }
 0x25f   : > { %v3121_v35 = vpack.c.bf16 %v979_v34, %v978_v33 }
 0x26e   : > { %v816_v40 = vpop.permute.xlu0 %815 }
 0x26f   : > { %v843_v42 = vrot.slane %v816_v40, %v3642_v41  ;;  %v986_v40 = vld [vmem:[%s4009_s6 + $0x50] sm:$0xff] }
 0x271   : > { %v873_v45 = vsel %vm872_vm4, %v847_v43, %v843_v42  ;;  %v987_v42 = vld [vmem:[%s4009_s6 + $0x58] sm:$0xff] }
 0x272   : > { %v828_v46 = vpop.permute.xlu0 %827  ;;  %v875_v49 = vsel %vm874_vm5, %v851_v47, %v873_v45 }
 0x273   : > { %v859_v51 = vrot.slane %v828_v46, %v3642_v41  ;;  %v877_v52 = vsel %vm876_vm6, %v855_v50, %v875_v49  ;;  %v3127_v46 = vpack.c.bf16 %v987_v42, %v986_v40  ;;  %v1230_v50 = vld [vmem:[%s4011_s8] sm:$0xff] }
 0x274   : > { %v1406_v42 = vld [vmem:[#allocation2 + $0x40] sm:$0xff] }
 0x275   : > { %v879_v56 = vsel %vm878_vm7, %v859_v51, %v877_v52  ;;  %v1231_v51 = vld [vmem:[%s4011_s8 + $0x8] sm:$0xff] }
 0x276   : > { %v834_v53 = vpop.permute.xlu0 %833  ;;  %v881_v59 = vsel %vm880_vm8, %v863_v54, %v879_v56  ;;  %v3130_v52 = vpack.c.bf16 %v1231_v51, %v1230_v50  ;;  %v1233_v54 = vld [vmem:[%s4011_s8 + $0x18] sm:$0xff]  ;;  %v1308_v56 = vld [vmem:[%s4012_s9] sm:$0x3]  ;;  %v1408_v51 = vld [vmem:[#allocation2 + $0x50] sm:$0xff] }
 0x277   : > { %v867_v57 = vrot.slane %v834_v53, %v3642_v41  ;;  %v1232_v53 = vld [vmem:[%s4011_s8 + $0x10] sm:$0xff] }
 0x278   : > { %v3133_v55 = vpack.c.bf16 %v1233_v54, %v1232_v53 }
 0x279   : > { %v883_v62 = vsel %vm882_vm9, %v867_v57, %v881_v59 }
 0x27a   : > { %v799_v2 = vpop.permute.xlu0 %798  ;;  %v885_v4 = vsel %vm884_vm10, %v871_v60, %v883_v62 }
 0x27c   : > { %3266 = vset.pattern.permute.xlu1 %v3388_v11 }
 0x2de   : > { %v781_v61 = vpop.trf.xlu1 }
 0x2df   : > { %v804_v63 = vrot.slane %v781_v61, %v3656_v58 }
 0x2e1   : > { %v805_v3 = vadd.f32 %v804_v63, %v799_v2  ;;  %v2734_v2 = vld [vmem:[%s4010_s7] ss:$0 sm:$0xff] }
 0x2e3   : > { %v887_v6 = vadd.f32 %v885_v4, %v805_v3 }
 0x2e5   : > { %vm888_vm12 = vcmp.gt.f32.partialorder %v887_v6, 0.0  ;;  %v889_v7 = vmul.f32 0.2, %v887_v6 }
 0x2e7   : > { %v890_v8 = vsel %vm888_vm12, %v887_v6, %v889_v7 }
 0x2e8   : > { %v891_v9 = vsel %vm463_vm11, %v890_v8, -9e+15 }
 0x2e9   : > { %v892_v10 = vsel %vm549_vm2, %v891_v9, -inf }
 0x2ea   : > { %893 = vmax.xlane.f32.xlu0 %v892_v10 }
 0x377   : > { %v894_v12 = vpop.xlane.xlu0 %893 }
 0x378   : > { %v895_v13 = vsub.f32 %v891_v9, %v894_v12 }
 0x37a   : > { %v896_v14 = vmul.f32 1.442695, %v895_v13 }
 0x37c   : > { %3268 = vpow2.f32 %v896_v14 }
 0x386   : > { %v3269_v15 = vpop.eup %3268 }
 0x387   : > { %v898_v16 = vsel %vm549_vm2, %v3269_v15, 0.0 }
 0x388   : > { %899 = vadd.xlane.f32.xlu0 %v898_v16 }
 0x39e   : > { %1649 = vrot.lane.b32.xlu0 %v3606_v22, %s3389_s23  ;;  %v983_v22 = vld [vmem:[%s4009_s6 + $0x38] sm:$0xff]  ;;  %s2715_s23 = sshll.u32 %s445_s28, 3 }
 0x39f   : > { %v3115_v23 = vpack.c.bf16 %v983_v22, %v982_v19  ;;  %v1402_v19 = vld [vmem:[#allocation2 + $0x20] sm:$0xff]  ;;  %s447_s29 = scalar_lea.vmem [#allocation5], %s2715_s23 }
 0x3a0   : > { %v1398_v22 = vld [vmem:[#allocation2] sm:$0xff]  ;;  %s2614_s17 = sshll.u32 %s447_s29, 4  ;;  %s3962_s17 = int_to_ptr.vmem [resolvable:$true] %s2614_s17 }
 0x3a1   : > { %3116 = vmatpush3.bf16.msra.mxu1 %v3115_v23  ;;  %v3136_v23 = vpack.c.bf16 %v1403_v21, %v1402_v19  ;;  %s3312_s18 = scalar_lea.vmem %s3962_s17, 128  ;;  %p3319_p2 = scmp.lt.s32.totalorder %s3962_s17, %s3317_s14 }
 0x3a2   : > { %1769 = vperm.xlu0 %3265, %v3617_v25   ;;  %3123 = vmatprep.subr.bf16.mxu1 %v3383_v0  ;;  %v976_v25 = vld [vmem:[%s4009_s6] sm:$0xff]  ;;  %p3313_p6 = scmp.ne.s32.totalorder %s3962_s17, %s3312_s18  ;;  %p3320_p3 = scmp.lt.s32.totalorder %s3318_s26, %s3312_s18 }
 0x3a4   : > { %p3314_p10 = pnand %p3313_p6, %p4038_p9  ;;  %p3321_p4 = por %p3320_p3, %p3319_p2 }
 0x3a6   : > { %1772 = vperm.xlu0 %3265, %v3614_v24   ;;  %p3315_p12 = pneg %p3314_p10 }
 0x3a8   : > { %p3322_p7 = pnand %p3321_p4, %p3315_p12 }
 0x3aa   : > { %1778 = vperm.xlu0 %3265, %v3619_v26   ;;  %v977_v26 = vld [vmem:[%s4009_s6 + $0x8] sm:$0xff] }
 0x3ae   : > { %1784 = vperm.xlu0 %3265, %v3625_v28  }
 0x3b2   : > { %1790 = vperm.xlu0 %3265, %v3630_v30   ;;  %v3118_v30 = vpack.c.bf16 %v977_v26, %v976_v25  ;;  %v1404_v25 = vld [vmem:[#allocation2 + $0x30] sm:$0xff]  ;;  %v1405_v26 = vld [vmem:[#allocation2 + $0x38] sm:$0xff] }
 0x3b3   : > { %v3139_v33 = vpack.c.bf16 %v1405_v26, %v1404_v25 }
 0x415   : > { %v900_v24 = vpop.xlane.xlu0 %899 }
 0x416   : > { %3270 = vrcp.f32 %v900_v24  ;;  %v1399_v24 = vld [vmem:[#allocation2 + $0x8] sm:$0xff] }
 0x420   : > { %v3271_v28 = vpop.eup %3270 }
 0x421   : > { %v902_v32 = vmul.f32 %v3271_v28, %v3269_v15  ;;  %v3142_v28 = vpack.c.bf16 %v1399_v24, %v1398_v22 }
 0x423   : > { %2920 = vmatmul.mubr.msk.f32.vlgmr.msra.gmra.mrb[8].mxu0 %vm549_vm2, %v902_v32  ;;  %v1401_v32 = vld [vmem:[#allocation2 + $0x18] sm:$0xff] }
 0x424   : > { %3119 = vmatpush3.bf16.msra.mxu0 %v3118_v30  ;;  %2941 = vmatprep.mubr.msk.f32.mxu0 %vm3384_vm0, %v3385_v1  ;;  %v1400_v30 = vld [vmem:[#allocation2 + $0x10] sm:$0xff] }
 0x425   : > { %3120 = vmatprep.subr.bf16.mxu0 %v3383_v0  ;;  %v3145_v34 = vpack.c.bf16 %v1401_v32, %v1400_v30 }
 0x428   : > { %3122 = vmatpush3.bf16.msra.mxu0 %v3121_v35 }
 0x429   : > { %3129 = vmatprep.subr.bf16.mxu0 %v3383_v0 }
 0x4f6   : > { %v3724_v43 = vpop.f32.mrb[8].mxu0 }
 0x4f7   : > { %v988_v44 = vrot.slane %v3724_v43, 7  ;;  %v2921_v45 = vpop.f32.mrb[9].mxu0  ;;  %2931 = vmatmul.mubr.msk.f32.vlgmr.msra.gmra.mrb[4].mxu1 %vm687_vm3, %v3724_v43  ;;  %v990_v48 = vrot.slane %v3724_v43, 1 }
 0x4f8   : > { %3125 = vmatpush3.bf16.msra.mxu1 %v3124_v39  ;;  %2952 = vmatprep.mubr.msk.f32.mxu1 %vm3384_vm0, %v3385_v1 }
 0x4f9   : > { %v989_v47 = vsel %vm681_vm13, 0.0, %v988_v44  ;;  %3126 = vmatprep.subr.bf16.mxu1 %v3383_v0  ;;  %v991_v49 = vsel %vm682_vm14, 0.0, %v990_v48  ;;  %v1407_v44 = vld [vmem:[#allocation2 + $0x48] sm:$0xff]  ;;  %v2743_v48 = vld [vmem:[%s4008_s5 + $0x20] sm:$0xff] }
 0x4fa   : > { %2942 = vmatmul.mubr.msk.f32.vlgmr.msra.gmra.mrb[10].mxu0 %vm687_vm3, %v989_v47  ;;  %v3148_v47 = vpack.c.bf16 %v1407_v44, %v1406_v42 }
 0x4fb   : > { %2963 = vmatprep.mubr.msk.f32.mxu0 %vm3384_vm0, %v3385_v1  ;;  %3131 = vmatpush3.bf16.msra.mxu0 %v3130_v52  ;;  %v1409_v52 = vld [vmem:[#allocation2 + $0x58] sm:$0xff] }
 0x4fc   : > { %3128 = vmatpush3.bf16.msra.mxu1 %v3127_v46  ;;  %3132 = vmatprep.subr.bf16.mxu0 %v3383_v0 }
 0x4fd   : > { %2966 = vmatprep.subr.mxu1 %v3385_v1 }
 0x4ff   : > { %2953 = vmatmul.mubr.msk.f32.vlgmr.msra.gmra.mrb[6].mxu1 %vm687_vm3, %v991_v49  ;;  %3134 = vmatpush3.bf16.msra.mxu0 %v3133_v55  ;;  %v2744_v49 = vld [vmem:[%s4008_s5 + $0x28] sm:$0xff]  ;;  %v3151_v55 = vpack.c.bf16 %v1409_v52, %v1408_v51 }
 0x500   : > { %2968 = vmatprep.mubr.msk.f32.mxu1 %vm3384_vm0, %v3385_v1  ;;  %3141 = vmatprep.subr.bf16.mxu0 %v3383_v0  ;;  %v3154_v54 = vpack.c.bf16 %v2744_v49, %v2743_v48 }
 0x501   : > { %2967 = vmatpush3.msk.msra.mxu1 %vm1313_vm15, %v1308_v56  ;;  %v2745_v56 = vld [vmem:[%s4008_s5 + $0x30] sm:$0xff] }
 0x502   : > { %3135 = vmatprep.subr.bf16.mxu1 %v3383_v0 }
 0x5ca   : > { %v1061_v57 = vpop.f32.mrb[4].mxu1 }
 0x5cb   : > { %v2932_v59 = vpop.f32.mrb[5].mxu1 }
 0x5cd   : > { %v1134_v60 = vpop.f32.mrb[10].mxu0 }
 0x5ce   : > { %v1135_v61 = vadd.f32 %v1134_v60, %v1061_v57  ;;  %v2943_v62 = vpop.f32.mrb[11].mxu0  ;;  %v2746_v57 = vld [vmem:[%s4008_s5 + $0x38] sm:$0xff] }
 0x5d2   : > { %v1207_v63 = vpop.f32.mrb[6].mxu1 }
 0x5d3   : > { %v1211_v3 = vadd.f32 %v1207_v63, %v1135_v61  ;;  %v2954_v4 = vpop.f32.mrb[7].mxu1  ;;  %v3157_v61 = vpack.c.bf16 %v2746_v57, %v2745_v56  ;;  %v1650_v63 = vpop.permute.xlu0 %1649  ;;  %v2755_v56 = vld [vmem:[%s4009_s6 + $0x90] sm:$0xff] }
 0x5d5   : > { %v1219_v6 = vadd.f32 %v2734_v2, %v1211_v3 }
 0x5d7   : > { %v1220_v7 = vmax.f32 %v1219_v6, 0.0 }
 0x5d9   : > { %v1221_v8 = vsel %vm687_vm3, %v1220_v7, 0.0 }
 0x5da   : > { %v1222_v9 = vrot.slane %v1221_v8, 4 }
 0x5dc   : > { %v1223_v10 = vadd.f32 %v1222_v9, %v1221_v8  ;;  %v2742_v9 = vld [vmem:[%s4014_s11] ss:$0 sm:$0xff] }
 0x5de   : > { %v1224_v11 = vrot.slane %v1223_v10, 2 }
 0x5e0   : > { %v1225_v12 = vadd.f32 %v1224_v11, %v1223_v10 }
 0x5e2   : > { %v1226_v13 = vrot.slane %v1225_v12, 1 }
 0x5e4   : > { %v1227_v14 = vadd.f32 %v1226_v13, %v1225_v12 }
 0x5e6   : > { %v1229_v15 = vmul.f32 0.125, %v1227_v14 }
 0x5e8   : > { %2964 = vmatmul.mubr.msk.f32.vlgmr.msra.gmra.mrb[12].mxu0 %vm687_vm3, %v1229_v15 }
 0x5e9   : > { %2990 = vmatprep.mubr.msk.f32.mxu0 %vm3384_vm0, %v3385_v1  ;;  %3143 = vmatpush3.bf16.msra.mxu0 %v3142_v28 }
 0x5ea   : > { %3144 = vmatprep.subr.bf16.mxu0 %v3383_v0 }
 0x5ed   : > { %3146 = vmatpush3.bf16.msra.mxu0 %v3145_v34 }
 0x5ee   : > { %3153 = vmatprep.subr.bf16.mxu0 %v3383_v0 }
 0x6bb   : > { %v1303_v16 = vpop.f32.mrb[12].mxu0 }
 0x6bc   : > { %v1307_v17 = vmax.f32 %v1303_v16, 0.0  ;;  %v2965_v18 = vpop.f32.mrb[13].mxu0 }
 0x6be   : > { %2969 = vmatmul.mubr.msk.f32.vlgmr.msra.gmra.mrb[8].mxu1 %vm1309_vm1, %v1307_v17  ;;  %v1770_v17 = vpop.permute.xlu0 %1769 }
 0x6bf   : > { %2979 = vmatprep.mubr.msk.f32.mxu1 %vm3384_vm0, %v3385_v1  ;;  %3137 = vmatpush3.bf16.msra.mxu1 %v3136_v23 }
 0x6c0   : > { %3138 = vmatprep.subr.bf16.mxu1 %v3383_v0 }
 0x6c2   : > { %v1773_v18 = vpop.permute.xlu0 %1772 }
 0x6c3   : > { %3140 = vmatpush3.bf16.msra.mxu1 %v3139_v33  ;;  %v1799_v22 = vrot.slane %v1773_v18, %v3642_v41 }
 0x6c4   : > { %3147 = vmatprep.subr.bf16.mxu1 %v3383_v0 }
 0x6c6   : > { %v1779_v21 = vpop.permute.xlu0 %1778 }
 0x6c7   : > { %v1807_v25 = vrot.slane %v1779_v21, %v3642_v41 }
 0x6ca   : > { %v1785_v24 = vpop.permute.xlu0 %1784 }
 0x6cb   : > { %v1815_v34 = vrot.slane %v1785_v24, %v3642_v41  ;;  %v2768_v24 = vld [vmem:[%s4011_s8 + $0x30] sm:$0xff] }
 0x6ce   : > { %v1791_v28 = vpop.permute.xlu0 %1790 }
 0x791   : > { %v1383_v35 = vpop.f32.mrb[8].mxu1 }
 0x792   : > { %v2738_v36 = vmul.f32 -1.442695, %v1383_v35  ;;  %v2970_v38 = vpop.f32.mrb[9].mxu1 }
 0x794   : > { %3272 = vpow2.f32 %v2738_v36 }
 0x79e   : > { %v3273_v39 = vpop.eup %3272 }
 0x79f   : > { %v1390_v40 = vadd.f32 1.0, %v3273_v39 }
 0x7a1   : > { %3274 = vrcp.f32 %v1390_v40  ;;  %v1823_v40 = vrot.slane %v1791_v28, %v3642_v41 }
 0x7ab   : > { %v3275_v45 = vpop.eup %3274 }
 0x7ac   : > { %v1396_v46 = vrot.slane %v3275_v45, %v3656_v58 }
 0x7ae   : > { %v1397_v50 = vmul.f32 %v1396_v46, %v1220_v7 }
 0x7b0   : > { %2980 = vmatmul.mubr.msk.f32.vlgmr.msra.gmra.mrb[10].mxu1 %vm687_vm3, %v1397_v50  ;;  %v1410_v53 = vrot.slane %v1397_v50, 7  ;;  %v1412_v60 = vrot.slane %v1397_v50, 1 }
 0x7b1   : > { %3149 = vmatpush3.bf16.msra.mxu1 %v3148_v47  ;;  %3001 = vmatprep.mubr.msk.f32.mxu1 %vm3384_vm0, %v3385_v1 }
 0x7b2   : > { %v1411_v59 = vsel %vm681_vm13, 0.0, %v1410_v53  ;;  %3150 = vmatprep.subr.bf16.mxu1 %v3383_v0  ;;  %v1413_v62 = vsel %vm682_vm14, 0.0, %v1412_v60 }
 0x7b3   : > { %2991 = vmatmul.mubr.msk.f32.vlgmr.msra.gmra.mrb[14].mxu0 %vm687_vm3, %v1411_v59  ;;  %v2756_v59 = vld [vmem:[%s4009_s6 + $0x98] sm:$0xff] }
 0x7b4   : > { %3155 = vmatpush3.bf16.msra.mxu0 %v3154_v54  ;;  %3012 = vmatprep.mubr.msk.f32.mxu0 %vm3384_vm0, %v3385_v1  ;;  %v3163_v60 = vpack.c.bf16 %v2756_v59, %v2755_v56  ;;  %v2346_v56 = vld [vmem:[#allocation2 + $0x60] sm:$0xff] }
 0x7b5   : > { %3152 = vmatpush3.bf16.msra.mxu1 %v3151_v55  ;;  %3156 = vmatprep.subr.bf16.mxu0 %v3383_v0  ;;  %v2753_v55 = vld [vmem:[%s4009_s6 + $0x80] sm:$0xff] }
 0x7b6   : > { %3015 = vmatprep.subr.mxu1 %v3385_v1  ;;  %v3160_v57 = vpack.c.bf16 %v2754_v5, %v2753_v55  ;;  %v2353_v5 = vld [vmem:[#allocation2 + $0x98] sm:$0xff] }
 0x7b8   : > { %3002 = vmatmul.mubr.msk.f32.vlgmr.msra.gmra.mrb[12].mxu1 %vm687_vm3, %v1413_v62  ;;  %3158 = vmatpush3.bf16.msra.mxu0 %v3157_v61  ;;  %v2749_v62 = vld [vmem:[%s4009_s6 + $0x60] sm:$0xff] }
 0x7b9   : > { %3016 = vmatpush3.msra.mxu1 %v1650_v63  ;;  %3017 = vmatprep.mubr.msk.f32.mxu1 %vm3384_vm0, %v3385_v1 }
 0x7ba   : > { %3159 = vmatprep.subr.bf16.mxu0 %v3383_v0  ;;  %3165 = vmatprep.subr.bf16.mxu1 %v3383_v0 }
 0x7bb   : > { %3013 = vmatmul.mubr.msk.f32.vlgmr.msra.gmra.mrb[16].mxu0 %vm687_vm3, %v1650_v63  ;;  %v2750_v63 = vld [vmem:[%s4009_s6 + $0x68] sm:$0xff] }
 0x7bc   : > { %3028 = vmatprep.mubr.msk.f32.mxu0 %vm3384_vm0, %v3385_v1  ;;  %3161 = vmatpush3.bf16.msra.mxu0 %v3160_v57  ;;  %v2347_v57 = vld [vmem:[#allocation2 + $0x68] sm:$0xff] }
 0x7bd   : > { %3162 = vmatprep.subr.bf16.mxu0 %v3383_v0  ;;  %v3190_v59 = vpack.c.bf16 %v2347_v57, %v2346_v56 }
 0x7c0   : > { %3164 = vmatpush3.bf16.msra.mxu0 %v3163_v60 }
 0x7c1   : > { %3171 = vmatprep.subr.bf16.mxu0 %v3383_v0 }
 0x883   : > { %v1483_v2 = vpop.f32.mrb[10].mxu1 }
 0x884   : > { %v2981_v3 = vpop.f32.mrb[11].mxu1 }
 0x885   : > { %v3166_v3 = vpack.c.bf16 %v2750_v63, %v2749_v62  ;;  %v2349_v62 = vld [vmem:[#allocation2 + $0x78] sm:$0xff] }
 0x886   : > { %v1556_v4 = vpop.f32.mrb[14].mxu0 }
 0x887   : > { %v1557_v6 = vadd.f32 %v1556_v4, %v1483_v2  ;;  %v2992_v7 = vpop.f32.mrb[15].mxu0 }
 0x888   : > { %v2752_v7 = vld [vmem:[%s4009_s6 + $0x78] sm:$0xff] }
 0x88b   : > { %v1629_v8 = vpop.f32.mrb[12].mxu1 }
 0x88c   : > { %v1633_v10 = vadd.f32 %v1629_v8, %v1557_v6  ;;  %v3003_v11 = vpop.f32.mrb[13].mxu1  ;;  %v2751_v6 = vld [vmem:[%s4009_s6 + $0x70] sm:$0xff] }
 0x88d   : > { %v3169_v8 = vpack.c.bf16 %v2752_v7, %v2751_v6 }
 0x88e   : > { %v1641_v12 = vadd.f32 %v2742_v9, %v1633_v10  ;;  %v1719_v13 = vpop.f32.mrb[16].mxu0  ;;  %v2757_v9 = vld [vmem:[%s4009_s6 + $0xa0] sm:$0xff]  ;;  %v2758_v10 = vld [vmem:[%s4009_s6 + $0xa8] sm:$0xff] }
 0x88f   : > { %1724 = vrot.lane.b32.xlu1 %v1719_v13, %s3387_s27  ;;  %v3014_v14 = vpop.f32.mrb[17].mxu0  ;;  %v3172_v11 = vpack.c.bf16 %v2758_v10, %v2757_v9  ;;  %v2355_v9 = vld [vmem:[#allocation2 + $0xa8] sm:$0xff] }
 0x890   : > { %v3818_v15 = vadd.f32 %v1641_v12, %v3724_v43  ;;  %v2759_v12 = vld [vmem:[%s4009_s6 + $0xb0] sm:$0xff] }
 0x893   : > { %1775 = vperm.xlu1 %3266, %v3621_v27   ;;  %v1795_v27 = vrot.slane %v1770_v17, %v3642_v41 }
 0x897   : > { %1781 = vperm.xlu1 %3266, %v3627_v29   ;;  %v1824_v29 = vsel %vm872_vm4, %v1799_v22, %v1795_v27 }
 0x89b   : > { %1787 = vperm.xlu1 %3266, %v3632_v31  }
 0x89f   : > { %3267 = vset.pattern.permute.xlu1 %v3386_v20 }
 0x8a0   : > { %1760 = vperm.xlu1 %3267, %v1719_v13   ;;  %v2760_v13 = vld [vmem:[%s4009_s6 + $0xb8] sm:$0xff] }
 0x8a1   : > { %v3175_v18 = vpack.c.bf16 %v2760_v13, %v2759_v12 }
 0x901   : > { %v1725_v16 = vpop.permute.xlu1 %1724 }
 0x902   : > { %1727 = vxpose.xlu0.b32.start.end [1/1] (short) (narrow) %v1725_v16, 8 }
 0x912   : > { %v1776_v19 = vpop.permute.xlu1 %1775 }
 0x913   : > { %v1803_v43 = vrot.slane %v1776_v19, %v3642_v41 }
 0x915   : > { %v1825_v31 = vsel %vm874_vm5, %v1803_v43, %v1824_v29  ;;  %v2767_v43 = vld [vmem:[%s4011_s8 + $0x28] sm:$0xff]  ;;  %v2769_v29 = vld [vmem:[%s4011_s8 + $0x38] sm:$0xff] }
 0x916   : > { %v1782_v23 = vpop.permute.xlu1 %1781  ;;  %v1826_v30 = vsel %vm876_vm6, %v1807_v25, %v1825_v31  ;;  %v3181_v31 = vpack.c.bf16 %v2769_v29, %v2768_v24 }
 0x917   : > { %v1811_v20 = vrot.slane %v1782_v23, %v3642_v41  ;;  %v2766_v23 = vld [vmem:[%s4011_s8 + $0x20] sm:$0xff] }
 0x918   : > { %v3178_v27 = vpack.c.bf16 %v2767_v43, %v2766_v23 }
 0x919   : > { %v1827_v32 = vsel %vm878_vm7, %v1811_v20, %v1826_v30 }
 0x91a   : > { %v1788_v26 = vpop.permute.xlu1 %1787  ;;  %v1828_v35 = vsel %vm880_vm8, %v1815_v34, %v1827_v32 }
 0x91b   : > { %v1819_v33 = vrot.slane %v1788_v26, %v3642_v41 }
 0x91d   : > { %v1829_v38 = vsel %vm882_vm9, %v1819_v33, %v1828_v35  ;;  %v2765_v33 = vld [vmem:[%s4010_s7 + $0x1] ss:$0 sm:$0xff] }
 0x91e   : > { %v1830_v45 = vsel %vm884_vm10, %v1823_v40, %v1829_v38 }
 0x91f   : > { %v1761_v42 = vpop.permute.xlu1 %1760 }
 0x982   : > { %v1743_v36 = vpop.trf.xlu0 }
 0x983   : > { %v1766_v39 = vrot.slane %v1743_v36, %v3656_v58 }
 0x985   : > { %v1767_v44 = vadd.f32 %v1766_v39, %v1761_v42 }
 0x987   : > { %v1832_v46 = vadd.f32 %v1830_v45, %v1767_v44 }
 0x989   : > { %vm1833_vm4 = vcmp.gt.f32.partialorder %v1832_v46, 0.0  ;;  %v1834_v47 = vmul.f32 0.2, %v1832_v46 }
 0x98b   : > { %v1835_v48 = vsel %vm1833_vm4, %v1832_v46, %v1834_v47 }
 0x98c   : > { %v1836_v49 = vsel %vm463_vm11, %v1835_v48, -9e+15 }
 0x98d   : > { %v1837_v50 = vsel %vm549_vm2, %v1836_v49, -inf }
 0x98e   : > { %1838 = vmax.xlane.f32.xlu1 %v1837_v50 }
 0xa1b   : > { %v1839_v51 = vpop.xlane.xlu1 %1838 }
 0xa1c   : > { %v1840_v52 = vsub.f32 %v1836_v49, %v1839_v51  ;;  %v2771_v49 = vld [vmem:[%s4012_s9 + $0x2] sm:$0x3] }
 0xa1e   : > { %v1841_v53 = vmul.f32 1.442695, %v1840_v52 }
 0xa20   : > { %3276 = vpow2.f32 %v1841_v53  ;;  %v2350_v53 = vld [vmem:[#allocation2 + $0x80] sm:$0xff] }
 0xa2a   : > { %v3277_v54 = vpop.eup %3276 }
 0xa2b   : > { %v1843_v41 = vsel %vm549_vm2, %v3277_v54, 0.0 }
 0xa2c   : > { %1844 = vadd.xlane.f32.xlu0 %v1843_v41  ;;  %v2352_v41 = vld [vmem:[#allocation2 + $0x90] sm:$0xff] }
 0xa2d   : > { %v3187_v60 = vpack.c.bf16 %v2353_v5, %v2352_v41 }
 0xab9   : > { %v1845_v61 = vpop.xlane.xlu0 %1844 }
 0xaba   : > { %3278 = vrcp.f32 %v1845_v61  ;;  %v2348_v61 = vld [vmem:[#allocation2 + $0x70] sm:$0xff] }
 0xabb   : > { %v3193_v63 = vpack.c.bf16 %v2349_v62, %v2348_v61 }
 0xac4   : > { %v3279_v2 = vpop.eup %3278 }
 0xac5   : > { %v1847_v4 = vmul.f32 %v3279_v2, %v3277_v54  ;;  %v2351_v54 = vld [vmem:[#allocation2 + $0x88] sm:$0xff] }
 0xac6   : > { %v3184_v55 = vpack.c.bf16 %v2351_v54, %v2350_v53 }
 0xac7   : > { %3018 = vmatmul.mubr.msk.f32.vlgmr.msra.gmra.mrb[14].mxu1 %vm549_vm2, %v1847_v4 }
 0xac8   : > { %3167 = vmatpush3.bf16.msra.mxu1 %v3166_v3  ;;  %3039 = vmatprep.mubr.msk.f32.mxu1 %vm3384_vm0, %v3385_v1 }
 0xac9   : > { %3168 = vmatprep.subr.bf16.mxu1 %v3383_v0 }
 0xacc   : > { %3170 = vmatpush3.bf16.msra.mxu1 %v3169_v8  ;;  %v2354_v8 = vld [vmem:[#allocation2 + $0xa0] sm:$0xff] }
 0xacd   : > { %3177 = vmatprep.subr.bf16.mxu1 %v3383_v0  ;;  %v3196_v12 = vpack.c.bf16 %v2355_v9, %v2354_v8 }
 0xb9a   : > { %v3887_v14 = vpop.f32.mrb[14].mxu1 }
 0xb9b   : > { %v1935_v16 = vrot.slane %v3887_v14, 7  ;;  %v3019_v17 = vpop.f32.mrb[15].mxu1  ;;  %3029 = vmatmul.mubr.msk.f32.vlgmr.msra.gmra.mrb[18].mxu0 %vm687_vm3, %v3887_v14  ;;  %v1937_v21 = vrot.slane %v3887_v14, 1 }
 0xb9c   : > { %3173 = vmatpush3.bf16.msra.mxu0 %v3172_v11  ;;  %3050 = vmatprep.mubr.msk.f32.mxu0 %vm3384_vm0, %v3385_v1  ;;  %v2357_v17 = vld [vmem:[#allocation2 + $0xb8] sm:$0xff] }
 0xb9d   : > { %v1936_v19 = vsel %vm681_vm13, 0.0, %v1935_v16  ;;  %3174 = vmatprep.subr.bf16.mxu0 %v3383_v0  ;;  %v1938_v22 = vsel %vm682_vm14, 0.0, %v1937_v21  ;;  %v2356_v16 = vld [vmem:[#allocation2 + $0xb0] sm:$0xff] }
 0xb9e   : > { %3040 = vmatmul.mubr.msk.f32.vlgmr.msra.gmra.mrb[16].mxu1 %vm687_vm3, %v1936_v19  ;;  %v3199_v19 = vpack.c.bf16 %v2357_v17, %v2356_v16 }
 0xb9f   : > { %3061 = vmatprep.mubr.msk.f32.mxu1 %vm3384_vm0, %v3385_v1  ;;  %3179 = vmatpush3.bf16.msra.mxu1 %v3178_v27 }
 0xba0   : > { %3176 = vmatpush3.bf16.msra.mxu0 %v3175_v18  ;;  %3180 = vmatprep.subr.bf16.mxu1 %v3383_v0 }
 0xba1   : > { %3189 = vmatprep.subr.bf16.mxu0 %v3383_v0 }
 0xba3   : > { %3051 = vmatmul.mubr.msk.f32.vlgmr.msra.gmra.mrb[20].mxu0 %vm687_vm3, %v1938_v22  ;;  %3182 = vmatpush3.bf16.msra.mxu1 %v3181_v31 }
 0xba4   : > { %3088 = vmatprep.mubr.msk.f32.mxu0 %vm3384_vm0, %v3385_v1  ;;  %3064 = vmatprep.subr.mxu1 %v3385_v1 }
 0xba5   : > { %3191 = vmatpush3.bf16.msra.mxu0 %v3190_v59 }
 0xba6   : > { %3192 = vmatprep.subr.bf16.mxu0 %v3383_v0 }
 0xba9   : > { %3194 = vmatpush3.bf16.msra.mxu0 %v3193_v63 }
 0xc6e   : > { %v2008_v20 = vpop.f32.mrb[18].mxu0 }
 0xc6f   : > { %v3030_v25 = vpop.f32.mrb[19].mxu0 }
 0xc71   : > { %v2081_v26 = vpop.f32.mrb[16].mxu1 }
 0xc72   : > { %v2082_v28 = vadd.f32 %v2081_v26, %v2008_v20  ;;  %v3041_v30 = vpop.f32.mrb[17].mxu1 }
 0xc76   : > { %v2154_v32 = vpop.f32.mrb[20].mxu0 }
 0xc77   : > { %v2158_v34 = vadd.f32 %v2154_v32, %v2082_v28  ;;  %v3052_v35 = vpop.f32.mrb[21].mxu0  ;;  %v1643_v28 = vmax.f32 %v3818_v15, 0.0 }
 0xc79   : > { %v2167_v36 = vadd.f32 %v2765_v33, %v2158_v34 }
 0xc7b   : > { %v2168_v38 = vmax.f32 %v2167_v36, 0.0 }
 0xc7d   : > { %v2169_v39 = vsel %vm687_vm3, %v2168_v38, 0.0 }
 0xc7e   : > { %v2170_v40 = vrot.slane %v2169_v39, 4 }
 0xc80   : > { %v2171_v42 = vadd.f32 %v2170_v40, %v2169_v39 }
 0xc82   : > { %v2172_v44 = vrot.slane %v2171_v42, 2 }
 0xc84   : > { %v2173_v45 = vadd.f32 %v2172_v44, %v2171_v42 }
 0xc86   : > { %v2174_v46 = vrot.slane %v2173_v45, 1 }
 0xc88   : > { %v2175_v47 = vadd.f32 %v2174_v46, %v2173_v45 }
 0xc8a   : > { %v2176_v48 = vmul.f32 0.125, %v2175_v47 }
 0xc8c   : > { %3062 = vmatmul.mubr.msk.f32.vlgmr.msra.gmra.mrb[18].mxu1 %vm687_vm3, %v2176_v48 }
 0xc8d   : > { %3065 = vmatpush3.msk.msra.mxu1 %vm1313_vm15, %v2771_v49  ;;  %3066 = vmatprep.mubr.msk.f32.mxu1 %vm3384_vm0, %v3385_v1 }
 0xc8e   : > { %3183 = vmatprep.subr.bf16.mxu1 %v3383_v0 }
 0xd5f   : > { %v2251_v50 = vpop.f32.mrb[18].mxu1 }
 0xd60   : > { %v2255_v51 = vmax.f32 %v2251_v50, 0.0  ;;  %v3063_v52 = vpop.f32.mrb[19].mxu1 }
 0xd62   : > { %3067 = vmatmul.mubr.msk.f32.vlgmr.msra.gmra.mrb[20].mxu1 %vm1309_vm1, %v2255_v51 }
 0xd63   : > { %3077 = vmatprep.mubr.msk.f32.mxu1 %vm3384_vm0, %v3385_v1  ;;  %3185 = vmatpush3.bf16.msra.mxu1 %v3184_v55 }
 0xd64   : > { %3186 = vmatprep.subr.bf16.mxu1 %v3383_v0 }
 0xd67   : > { %3188 = vmatpush3.bf16.msra.mxu1 %v3187_v60 }
 0xd68   : > { %3195 = vmatprep.subr.bf16.mxu1 %v3383_v0 }
 0xe35   : > { %v2330_v2 = vpop.f32.mrb[20].mxu1 }
 0xe36   : > { %v2774_v3 = vmul.f32 -1.442695, %v2330_v2  ;;  %v3068_v4 = vpop.f32.mrb[21].mxu1 }
 0xe38   : > { %3280 = vpow2.f32 %v2774_v3 }
 0xe42   : > { %v3281_v6 = vpop.eup %3280 }
 0xe43   : > { %v2337_v7 = vadd.f32 1.0, %v3281_v6 }
 0xe45   : > { %3282 = vrcp.f32 %v2337_v7 }
 0xe4f   : > { %v3283_v10 = vpop.eup %3282 }
 0xe50   : > { %v2343_v11 = vrot.slane %v3283_v10, %v3656_v58 }
 0xe52   : > { %v2344_v13 = vmul.f32 %v2343_v11, %v2168_v38 }
 0xe54   : > { %3078 = vmatmul.mubr.msk.f32.vlgmr.msra.gmra.mrb[22].mxu1 %vm687_vm3, %v2344_v13  ;;  %v2358_v18 = vrot.slane %v2344_v13, 7  ;;  %v2360_v58 = vrot.slane %v2344_v13, 1 }
 0xe55   : > { %3197 = vmatpush3.bf16.msra.mxu1 %v3196_v12  ;;  %3099 = vmatprep.mubr.msk.f32.mxu1 %vm3384_vm0, %v3385_v1  ;;  %vm2598_vm0 = vcmask 523264  }
 0xe56   : > { %v2359_v21 = vsel %vm681_vm13, 0.0, %v2358_v18  ;;  %3198 = vmatprep.subr.bf16.mxu1 %v3383_v0  ;;  %v2361_v22 = vsel %vm682_vm14, 0.0, %v2360_v58  ;;  %v2779_v0 = vld [vmem:[%s4014_s11 + $0x1] ss:$0 sm:$0xff] }
 0xe57   : > { %3089 = vmatmul.mubr.msk.f32.vlgmr.msra.gmra.mrb[22].mxu0 %vm687_vm3, %v2359_v21 }
 0xe59   : > { %3200 = vmatpush3.bf16.msra.mxu1 %v3199_v19 }
 0xe5c   : > { %3100 = vmatmul.mubr.msk.f32.vlgmr.msra.gmra.mrb[24].mxu1 %vm687_vm3, %v2361_v22 }
 0xf27   : > { %v2431_v23 = vpop.f32.mrb[22].mxu1 }
 0xf28   : > { %v3079_v43 = vpop.f32.mrb[23].mxu1 }
 0xf2a   : > { %v2504_v27 = vpop.f32.mrb[22].mxu0 }
 0xf2b   : > { %v2505_v1 = vadd.f32 %v2504_v27, %v2431_v23  ;;  %v3090_v24 = vpop.f32.mrb[23].mxu0 }
 0xf2f   : > { %v2577_v29 = vpop.f32.mrb[24].mxu1 }
 0xf30   : > { %v2581_v31 = vadd.f32 %v2577_v29, %v2505_v1  ;;  %v3101_v20 = vpop.f32.mrb[25].mxu1 }
 0xf32   : > { %v2590_v25 = vadd.f32 %v2779_v0, %v2581_v31 }
 0xf34   : > { %v2591_v37 = vadd.f32 %v2590_v25, %v3887_v14 }
 0xf36   : > { %v2592_v26 = vmax.f32 %v2591_v37, 0.0 }
 0xf38   : > { %2594 = vrot.lane.b32.xlu1 %v2592_v26, %s3390_s20 }
 0xfaa   : > { %v2595_v30 = vpop.permute.xlu1 %2594 }
 0xfab   : > { %v2597_v14 = vsel %vm687_vm3, %v1643_v28, %v2595_v30 }
 0xfac   : > { %2599 = vst.msk [vmem:[%s447_s29] sm:$0xff] %vm2598_vm0, %v2597_v14 }
 0xfad   : > { %3325 = shalt.err (!%p3322_p7)
}
 0xfae   : > { %s3326_s16 = scalar_lea.hbm %s3960_s15, 128  ;;  %s3330_s28 = scalar_lea.hbm %s4015_s12, 256 }
 0xfaf   : > { %p3327_p8 = scmp.ne.s32.totalorder %s3960_s15, %s3326_s16  ;;  %p3331_p1 = scmp.lt.u32.totalorder %s3960_s15, %s4015_s12 }
 0xfb0   : > { %p3332_p0 = scmp.lt.u32.totalorder %s3330_s28, %s3326_s16  ;;  %p3334_p6 = scmp.lt.u32.totalorder %s3326_s16, %s3960_s15 }
 0xfb1   : > { %p3328_p11 = pnand %p3327_p8, %p4038_p9 }
 0xfb2   : > { %p3333_p5 = por %p3332_p0, %p3331_p1 }
 0xfb3   : > { %p3329_p13 = pneg %p3328_p11 }
 0xfb4   : > { %p3335_p10 = por %p3334_p6, %p3333_p5 }
 0xfb6   : > { %p3336_p12 = pnand %p3335_p10, %p3329_p13 }
 0xfb8   : > { %3339 = shalt.err (!%p3336_p12)
}
 0xfb9   : > { %3207 = dma.vmem_to_hbm [thread:$0]  (%p4038_p9), %s3962_s17, 128, %s3960_s15, %s2601_s25  }
 0xfba PF: > { %s4039_s29 = sld [smem:[#allocation8_spill]]  ;;  %s4040_s10 = sld [smem:[#allocation12_spill]] }
 0xfbb   : > { %p3219_p2 = scmp.ge.s32.totalorder %s3378_s24, 2 }
 0xfc0   : > { %s2626_s27 = sand.u32 1, %s4039_s29   ;;  %p4041_p3 = scmp.ne.s32.totalorder %s4040_s10, 0 }
 0xfc1   : > { %s2627_s18 = scalar_lea.sflag [#allocation4], %s2626_s27 }
 0xfc2   : > { %p3214_p4 = pnand %p3219_p2, %p4041_p3 }
 0xfc4   : > { %3361 = dma.done.wait (!%p3214_p4), %s2627_s18, 128  }
 0xfc5   : > { %3363 = vsyncadd (!%p3214_p4), %s2627_s18, 4294967168  ;;  %s4042_s24 = sld [smem:[#allocation10_spill]]  ;;  %s4043_s14 = sld [smem:[#allocation9_spill]] }
 0xfc6   : > { %s4044_s23 = sld [smem:[#allocation11_spill]]  ;;  %s4045_s21 = smov %s3370_s22 }
 0xfcb   : > { %p23_p7 = scmp.ge.s32.totalorder %s4042_s24, 4   ;;  %s4046_s22 = smov %s4043_s14 }
 0xfcd   :  { %25 = sbr.rel (!%p23_p7) target bundleno = 6 (0x6), region = 121 }
 0xfd4   :  { %2632 = vsyncpa [#allocation3], 1 }
 0xfd5   :  { %2634 = vsyncpa [#allocation3 + $0x1], 1 }
 0xfd6   :  { %2635 = vsyncpa [#allocation4], 1 }
 0xfd7   :  { %2637 = vsyncpa [#allocation4 + $0x1], 1 }

</bundles_post_ra>
